<compile_context>
chip_gen: v6e
topology: v6e:2x2x1
jax: 0.10.0
libtpu: 0.0.40
codegen_flags: <defaults>
</compile_context>

<pallas_src>
import functools

import jax
import jax.numpy as jnp
from jax.experimental import pallas as pl
from jax.experimental.pallas import tpu as pltpu

D_K = 64
D_V = 64
N_HEADS = 4
LN_EPS = 1e-5  # PyTorch nn.LayerNorm default


def _make_mha_kernel(shared, approx_recip):
    """Builds the fused MHA kernel.  `shared` => single activation input."""

    def kernel(*refs):
        if shared:
            (x_ref, wq_ref, wk_ref, wv_ref, wfc_ref,
             gamma_ref, beta_ref, out_ref, ctx_ref) = refs
            xq_ref = x_ref
        else:
            (xq_ref, xk_ref, xv_ref, wq_ref, wk_ref, wv_ref, wfc_ref,
             gamma_ref, beta_ref, out_ref, ctx_ref) = refs

        Bt, S, D = xq_ref.shape
        H = N_HEADS * D_K
        cdt = xq_ref.dtype  # narrow compute dtype for MXU operands

        # NOTE: S should be a multiple of 8 so (Bt, S, D) -> (Bt*S, D) is a
        # layout-free reshape (no hidden VMEM copy per input per step).
        xq2 = xq_ref[...].reshape(Bt * S, D)
        if shared:
            xk2 = xq2
            xv2 = xq2
        else:
            xk2 = xk_ref[...].reshape(Bt * S, D)
            xv2 = xv_ref[...].reshape(Bt * S, D)

        # ---- Q / K / V projections (narrow-dtype operands, f32 accumulation) ----
        q = jnp.dot(xq2, wq_ref[...], preferred_element_type=jnp.float32)  # (Bt*S, H)
        k = jnp.dot(xk2, wk_ref[...], preferred_element_type=jnp.float32)
        v = jnp.dot(xv2, wv_ref[...], preferred_element_type=jnp.float32)

        # Fold 1/sqrt(d_k) into Q once (Bt*S*H mults, not S^2 per head per batch).
        q = q * jnp.float32(1.0 / (D_K ** 0.5))

        # Cast MXU operands back to the narrow activation dtype (no-op for f32).
        q = q.astype(cdt).reshape(Bt, S, H)
        k = k.astype(cdt).reshape(Bt, S, H)
        v = v.astype(cdt).reshape(Bt, S, H)

        # Hoisted per-head views (one slice per tensor per head, outside the
        # matmul chain).
        # TODO(synk): a single (Bt,S,NH,dk)->(Bt,NH,S,dk) relayout would batch the
        # heads into one dot_general; kept as hoisted slices for robust lowering
        # (the slices are XLU work on an otherwise idle unit).
        q_h = [q[:, :, h * D_K:(h + 1) * D_K] for h in range(N_HEADS)]
        k_h = [k[:, :, h * D_K:(h + 1) * D_K] for h in range(N_HEADS)]
        v_h = [v[:, :, h * D_V:(h + 1) * D_V] for h in range(N_HEADS)]

        # ---- per-head attention; stage contexts for a single fused out-proj ----
        for h in range(N_HEADS):  # static unroll, 4 heads
            # scores[b, q, k] = sum_d qh[b, q, d] * kh[b, k, d]   (no K transpose)
            scores = jax.lax.dot_general(
                q_h[h], k_h[h],
                dimension_numbers=(((2,), (2,)), ((0,), (0,))),
                preferred_element_type=jnp.float32)             # (Bt, S, S) f32

            # numerically-stable softmax over the key axis (f32 math)
            scores = scores - jnp.max(scores, axis=-1, keepdims=True)
            e = jnp.exp(scores)
            denom = jnp.sum(e, axis=-1, keepdims=True)
            if approx_recip:
                attn = e * pl.reciprocal(denom, approx=True)    # EUP slot
            else:
                attn = e / denom

            # ctx[b, q, d] = sum_k attn[b, q, k] * vh[b, k, d]  (narrow operands)
            ctx = jax.lax.dot_general(
                attn.astype(cdt), v_h[h],
                dimension_numbers=(((2,), (1,)), ((0,), (0,))),
                preferred_element_type=jnp.float32)             # (Bt, S, d_v)

            # Stage this head's context so the output projection is one K=256 matmul.
            ctx_ref[:, pl.ds(h * D_V, D_V)] = (
                ctx.reshape(Bt * S, D_V).astype(cdt))

        # ---- output projection: single (Bt*S, H) x (H, D) matmul, f32 acc ----
        out_acc = jnp.dot(ctx_ref[...], wfc_ref[...],
                          preferred_element_type=jnp.float32)   # (Bt*S, D)

        # ---- residual + LayerNorm (f32 math) ----
        y = out_acc + xq2.astype(jnp.float32)
        mean = jnp.mean(y, axis=-1, keepdims=True)
        centered = y - mean
        var = jnp.mean(centered * centered, axis=-1, keepdims=True)  # biased, as in PyTorch
        normed = centered * jax.lax.rsqrt(var + jnp.float32(LN_EPS))

        gamma = gamma_ref[...].astype(jnp.float32)               # (1, D) lane-aligned
        beta = beta_ref[...].astype(jnp.float32)
        out = normed * gamma + beta
        out_ref[...] = out.reshape(Bt, S, D).astype(out_ref.dtype)

    return kernel


def _estimate_vmem_bytes(Bt, S, D, n_act, act_itemsize, w_itemsize):
    """Conservative per-grid-step VMEM footprint, including in-kernel
    intermediates (f32 q/k/v, one head's (S,S) score temporaries, ctx staging,
    LayerNorm temporaries), not just the double-buffered activation tiles."""
    H = N_HEADS * D_K
    rows = Bt * S
    act_tiles = (n_act + 1) * 2 * rows * D * act_itemsize        # in + out, double-buffered
    weights = 2 * (3 * D * H + H * D + 2 * D) * w_itemsize       # resident weights/vecs
    qkv_f32 = 3 * rows * H * 4                                   # f32 projection outputs
    qkv_cast = 0 if act_itemsize == 4 else 3 * rows * H * act_itemsize
    scores = 3 * Bt * S * S * 4                                  # scores / exp / attn (one head)
    ctx = rows * D_V * 4 + rows * H * act_itemsize               # per-head ctx + staging scratch
    epilogue = 3 * rows * D * 4                                  # out_acc, centered, normed
    return act_tiles + weights + qkv_f32 + qkv_cast + scores + ctx + epilogue


def _pick_block_batch(B, S, D, n_act, act_itemsize, w_itemsize, budget):
    """Largest divisor of B such that:
      * the full footprint stays within `budget`,
      * the grid keeps >= 2 steps (v7x dual TC + pipelining overlap),
      * Bt*S targets roughly [256, 1024] flattened rows."""
    best = 1
    for cand in range(1, B + 1):
        if B % cand:
            continue
        if B >= 2 and B // cand < 2:
            break
        if _estimate_vmem_bytes(cand, S, D, n_act, act_itemsize, w_itemsize) > budget:
            break
        best = cand
        if cand * S >= 1024:
            break
    return best


def _mha_pallas(acts, W_Q, W_K, W_V, W_fc, gamma, beta,
                *, shared, block_batch, approx_recip):
    input_Q = acts[0]
    n_act = len(acts)
    B, S, D = input_Q.shape
    H = N_HEADS * D_K

    act_itemsize = jnp.dtype(input_Q.dtype).itemsize
    w_itemsize = jnp.dtype(W_Q.dtype).itemsize

    # Generation-aware VMEM budget (v5e/v6e: 128 MiB physical, v7x: 64 MiB).
    try:
        vmem_cap = int(pltpu.get_tpu_info().vmem_capacity_bytes)
    except Exception:
        vmem_cap = 64 << 20  # conservative (v7x-sized) default
    budget = max(vmem_cap - (16 << 20), 12 << 20)

    Bt = (block_batch if block_batch is not None
          else _pick_block_batch(B, S, D, n_act, act_itemsize, w_itemsize, budget))
    assert B % Bt == 0, (B, Bt)

    footprint = _estimate_vmem_bytes(Bt, S, D, n_act, act_itemsize, w_itemsize)
    vmem_limit = int(min(max(32 << 20, 2 * footprint), max(vmem_cap - (8 << 20), 32 << 20)))

    gamma2 = gamma.reshape(1, D)
    beta2 = beta.reshape(1, D)

    seq_spec = pl.BlockSpec((Bt, S, D), lambda b: (b, 0, 0))
    w_in_spec = pl.BlockSpec((D, H), lambda b: (0, 0))      # resident across grid
    w_out_spec = pl.BlockSpec((H, D), lambda b: (0, 0))
    vec_spec = pl.BlockSpec((1, D), lambda b: (0, 0))

    in_specs = ([seq_spec] * n_act
                + [w_in_spec, w_in_spec, w_in_spec, w_out_spec, vec_spec, vec_spec])
    args = tuple(acts) + (W_Q, W_K, W_V, W_fc, gamma2, beta2)

    # Advisory cost estimate for XLA scheduling around the fused call.
    flops = (3 * 2 * B * S * D * H                       # Q/K/V projections
             + N_HEADS * 2 * (2 * B * S * S * D_K)       # scores + attn@V
             + 2 * B * S * H * D)                        # output projection
    transcendentals = B * N_HEADS * S * S                # softmax exp
    bytes_accessed = ((n_act + 1) * B * S * D * act_itemsize
                      + (3 * D * H + H * D + 2 * D) * w_itemsize)

    kernel = _make_mha_kernel(shared=shared, approx_recip=approx_recip)

    return pl.pallas_call(
        kernel,
        out_shape=jax.ShapeDtypeStruct((B, S, D), input_Q.dtype),
        grid_spec=pltpu.PrefetchScalarGridSpec(
            num_scalar_prefetch=0,
            grid=(B // Bt,),
            in_specs=in_specs,
            out_specs=seq_spec,
            scratch_shapes=[pltpu.VMEM((Bt * S, H), input_Q.dtype)],
        ),
        compiler_params=pltpu.CompilerParams(
            dimension_semantics=("parallel",),
            vmem_limit_bytes=vmem_limit),
        cost_estimate=pl.CostEstimate(flops=int(flops),
                                      transcendentals=int(transcendentals),
                                      bytes_accessed=int(bytes_accessed)),
    )(*args)


@functools.partial(jax.jit, static_argnames=("block_batch", "approx_recip"))
def _mha_distinct(input_Q, input_K, input_V, W_Q, W_K, W_V, W_fc, gamma, beta,
                  *, block_batch=None, approx_recip=True):
    return _mha_pallas((input_Q, input_K, input_V), W_Q, W_K, W_V, W_fc, gamma, beta,
                       shared=False, block_batch=block_batch, approx_recip=approx_recip)


@functools.partial(jax.jit, static_argnames=("block_batch", "approx_recip"))
def _mha_shared(x, W_Q, W_K, W_V, W_fc, gamma, beta,
                *, block_batch=None, approx_recip=True):
    return _mha_pallas((x,), W_Q, W_K, W_V, W_fc, gamma, beta,
                       shared=True, block_batch=block_batch, approx_recip=approx_recip)


def multi_head_attention(input_Q, input_K, input_V,
                         W_Q, W_K, W_V, W_fc, gamma, beta,
                         *, block_batch=None, approx_recip=True):
    """
    input_Q/K/V: (B, S, d_model)
    W_Q/W_K/W_V: (d_model, n_heads*d_k)  (transposed vs. nn.Linear.weight)
    W_fc:        (n_heads*d_v, d_model)
    gamma, beta: (d_model,)
    approx_recip: use the EUP approximate reciprocal in the softmax denominator
                  (~1e-3 relative error on attention rows); set False for exact
                  division when matching the PyTorch module bit-for-bit matters.
    returns:     (B, S, d_model)
    """
    if (input_K is input_Q) and (input_V is input_Q):   # self-attention: DMA x once
        return _mha_shared(input_Q, W_Q, W_K, W_V, W_fc, gamma, beta,
                           block_batch=block_batch, approx_recip=approx_recip)
    return _mha_distinct(input_Q, input_K, input_V, W_Q, W_K, W_V, W_fc, gamma, beta,
                         block_batch=block_batch, approx_recip=approx_recip)


def _reference(input_Q, input_K, input_V, W_Q, W_K, W_V, W_fc, gamma, beta):
    """Pure-JAX reference mirroring the PyTorch module."""
    B, S, D = input_Q.shape
    q = (input_Q @ W_Q).reshape(B, S, N_HEADS, D_K).transpose(0, 2, 1, 3)
    k = (input_K @ W_K).reshape(B, S, N_HEADS, D_K).transpose(0, 2, 1, 3)
    v = (input_V @ W_V).reshape(B, S, N_HEADS, D_V).transpose(0, 2, 1, 3)
    scores = jnp.einsum("bhqd,bhkd->bhqk", q, k) / jnp.sqrt(jnp.float32(D_K))
    attn = jax.nn.softmax(scores, axis=-1)
    ctx = jnp.einsum("bhqk,bhkd->bhqd", attn, v)
    ctx = ctx.transpose(0, 2, 1, 3).reshape(B, S, N_HEADS * D_V)
    out = ctx @ W_fc + input_Q
    mean = jnp.mean(out, axis=-1, keepdims=True)
    var = jnp.mean((out - mean) ** 2, axis=-1, keepdims=True)
    return (out - mean) / jnp.sqrt(var + LN_EPS) * gamma + beta


if __name__ == "__main__":
    B, S, D_MODEL = 2, 16, 128

    key = jax.random.PRNGKey(0)
    ks = jax.random.split(key, 7)

    input_Q = jax.random.normal(ks[0], (B, S, D_MODEL), dtype=jnp.float32)
    input_K = jax.random.normal(ks[1], (B, S, D_MODEL), dtype=jnp.float32)
    input_V = jax.random.normal(ks[2], (B, S, D_MODEL), dtype=jnp.float32)

    # Deterministic parameter init (Kaiming-uniform-ish scaling, not a checkpoint).
    W_Q = jax.random.uniform(ks[3], (D_MODEL, N_HEADS * D_K), jnp.float32,
                             -1.0, 1.0) / jnp.sqrt(D_MODEL)
    W_K = jax.random.uniform(ks[4], (D_MODEL, N_HEADS * D_K), jnp.float32,
                             -1.0, 1.0) / jnp.sqrt(D_MODEL)
    W_V = jax.random.uniform(ks[5], (D_MODEL, N_HEADS * D_V), jnp.float32,
                             -1.0, 1.0) / jnp.sqrt(D_MODEL)
    W_fc = jax.random.uniform(ks[6], (N_HEADS * D_V, D_MODEL), jnp.float32,
                              -1.0, 1.0) / jnp.sqrt(N_HEADS * D_V)
    gamma = jnp.ones((D_MODEL,), jnp.float32)
    beta = jnp.zeros((D_MODEL,), jnp.float32)

    # Cross-attention path (distinct Q/K/V inputs).
    out = multi_head_attention(input_Q, input_K, input_V,
                               W_Q, W_K, W_V, W_fc, gamma, beta)
    out = jax.block_until_ready(out)
    ref = _reference(input_Q, input_K, input_V, W_Q, W_K, W_V, W_fc, gamma, beta)
    assert out.shape == (B, S, D_MODEL)
    # Tolerance accounts for the EUP approximate reciprocal in the softmax
    # denominator (relative error ~1e-3 worst case through LayerNorm).
    assert jnp.allclose(out, ref, atol=5e-3, rtol=5e-3), (
        float(jnp.max(jnp.abs(out - ref))))

    # Self-attention path (single activation DMA per grid step).
    out_self = multi_head_attention(input_Q, input_Q, input_Q,
                                    W_Q, W_K, W_V, W_fc, gamma, beta)
    out_self = jax.block_until_ready(out_self)
    ref_self = _reference(input_Q, input_Q, input_Q, W_Q, W_K, W_V, W_fc, gamma, beta)
    assert jnp.allclose(out_self, ref_self, atol=5e-3, rtol=5e-3), (
        float(jnp.max(jnp.abs(out_self - ref_self))))

    print("KERNEL_OK")
</pallas_src>

<mosaic_0001>
module attributes {stable_mosaic.version = 11 : i64} {
  func.func @kernel(%arg0: i32, %arg1: memref<1x16x128xf32, #tpu.memory_space<vmem>>, %arg2: memref<1x16x128xf32, #tpu.memory_space<vmem>>, %arg3: memref<1x16x128xf32, #tpu.memory_space<vmem>>, %arg4: memref<128x256xf32, #tpu.memory_space<vmem>>, %arg5: memref<128x256xf32, #tpu.memory_space<vmem>>, %arg6: memref<128x256xf32, #tpu.memory_space<vmem>>, %arg7: memref<256x128xf32, #tpu.memory_space<vmem>>, %arg8: memref<1x128xf32, #tpu.memory_space<vmem>>, %arg9: memref<1x128xf32, #tpu.memory_space<vmem>>, %arg10: memref<1x16x128xf32, #tpu.memory_space<vmem>>, %arg11: memref<16x256xf32, #tpu.memory_space<vmem>>) attributes {dimension_semantics = [#tpu.dimension_semantics<parallel>], iteration_bounds = array<i64: 2>, scalar_prefetch = 0 : i64, scratch_operands = 1 : i64, tpu.core_type = #tpu.core_type<tc>, window_params = [{transform_indices = @transform_0, window_bounds = array<i64: 1, 16, 128>}, {transform_indices = @transform_1, window_bounds = array<i64: 1, 16, 128>}, {transform_indices = @transform_2, window_bounds = array<i64: 1, 16, 128>}, {pipeline_mode = #tpu.pipeline_mode<synchronous>, transform_indices = @transform_3, window_bounds = array<i64: 128, 256>}, {pipeline_mode = #tpu.pipeline_mode<synchronous>, transform_indices = @transform_4, window_bounds = array<i64: 128, 256>}, {pipeline_mode = #tpu.pipeline_mode<synchronous>, transform_indices = @transform_5, window_bounds = array<i64: 128, 256>}, {pipeline_mode = #tpu.pipeline_mode<synchronous>, transform_indices = @transform_6, window_bounds = array<i64: 256, 128>}, {pipeline_mode = #tpu.pipeline_mode<synchronous>, transform_indices = @transform_7, window_bounds = array<i64: 1, 128>}, {pipeline_mode = #tpu.pipeline_mode<synchronous>, transform_indices = @transform_8, window_bounds = array<i64: 1, 128>}, {transform_indices = @transform_9, window_bounds = array<i64: 1, 16, 128>}]} {
    %c0 = arith.constant 0 : index
    %c0_0 = arith.constant 0 : index
    %c0_1 = arith.constant 0 : index
    %0 = vector.load %arg1[%c0, %c0_0, %c0_1] : memref<1x16x128xf32, #tpu.memory_space<vmem>>, vector<1x16x128xf32>
    %1 = vector.shape_cast %0 : vector<1x16x128xf32> to vector<16x128xf32>
    %c0_2 = arith.constant 0 : index
    %c0_3 = arith.constant 0 : index
    %c0_4 = arith.constant 0 : index
    %2 = vector.load %arg2[%c0_2, %c0_3, %c0_4] : memref<1x16x128xf32, #tpu.memory_space<vmem>>, vector<1x16x128xf32>
    %3 = vector.shape_cast %2 : vector<1x16x128xf32> to vector<16x128xf32>
    %c0_5 = arith.constant 0 : index
    %c0_6 = arith.constant 0 : index
    %c0_7 = arith.constant 0 : index
    %4 = vector.load %arg3[%c0_5, %c0_6, %c0_7] : memref<1x16x128xf32, #tpu.memory_space<vmem>>, vector<1x16x128xf32>
    %5 = vector.shape_cast %4 : vector<1x16x128xf32> to vector<16x128xf32>
    %c0_8 = arith.constant 0 : index
    %c0_9 = arith.constant 0 : index
    %6 = vector.load %arg4[%c0_8, %c0_9] : memref<128x256xf32, #tpu.memory_space<vmem>>, vector<128x256xf32>
    %cst = arith.constant dense<0.000000e+00> : vector<16x256xf32>
    %7 = tpu.matmul %1, %6, %cst {dimension_numbers = #tpu.dot_dimension_numbers<[1], [0], [0], [1], [0, 0, 1, 1], [], []>} : vector<16x128xf32>, vector<128x256xf32>, vector<16x256xf32> -> vector<16x256xf32>
    %c0_10 = arith.constant 0 : index
    %c0_11 = arith.constant 0 : index
    %8 = vector.load %arg5[%c0_10, %c0_11] : memref<128x256xf32, #tpu.memory_space<vmem>>, vector<128x256xf32>
    %cst_12 = arith.constant dense<0.000000e+00> : vector<16x256xf32>
    %9 = tpu.matmul %3, %8, %cst_12 {dimension_numbers = #tpu.dot_dimension_numbers<[1], [0], [0], [1], [0, 0, 1, 1], [], []>} : vector<16x128xf32>, vector<128x256xf32>, vector<16x256xf32> -> vector<16x256xf32>
    %c0_13 = arith.constant 0 : index
    %c0_14 = arith.constant 0 : index
    %10 = vector.load %arg6[%c0_13, %c0_14] : memref<128x256xf32, #tpu.memory_space<vmem>>, vector<128x256xf32>
    %cst_15 = arith.constant dense<0.000000e+00> : vector<16x256xf32>
    %11 = tpu.matmul %5, %10, %cst_15 {dimension_numbers = #tpu.dot_dimension_numbers<[1], [0], [0], [1], [0, 0, 1, 1], [], []>} : vector<16x128xf32>, vector<128x256xf32>, vector<16x256xf32> -> vector<16x256xf32>
    %cst_16 = arith.constant 1.250000e-01 : f32
    %12 = vector.broadcast %cst_16 : f32 to vector<16x256xf32>
    %13 = arith.mulf %7, %12 : vector<16x256xf32>
    %14 = vector.shape_cast %13 : vector<16x256xf32> to vector<1x16x256xf32>
    %15 = vector.shape_cast %9 : vector<16x256xf32> to vector<1x16x256xf32>
    %16 = vector.shape_cast %11 : vector<16x256xf32> to vector<1x16x256xf32>
    %17 = vector.extract_strided_slice %14 {offsets = [0, 0, 0], sizes = [1, 16, 64], strides = [1, 1, 1]} : vector<1x16x256xf32> to vector<1x16x64xf32>
    %18 = vector.extract_strided_slice %14 {offsets = [0, 0, 64], sizes = [1, 16, 64], strides = [1, 1, 1]} : vector<1x16x256xf32> to vector<1x16x64xf32>
    %19 = vector.extract_strided_slice %14 {offsets = [0, 0, 128], sizes = [1, 16, 64], strides = [1, 1, 1]} : vector<1x16x256xf32> to vector<1x16x64xf32>
    %20 = vector.extract_strided_slice %14 {offsets = [0, 0, 192], sizes = [1, 16, 64], strides = [1, 1, 1]} : vector<1x16x256xf32> to vector<1x16x64xf32>
    %21 = vector.extract_strided_slice %15 {offsets = [0, 0, 0], sizes = [1, 16, 64], strides = [1, 1, 1]} : vector<1x16x256xf32> to vector<1x16x64xf32>
    %22 = vector.extract_strided_slice %15 {offsets = [0, 0, 64], sizes = [1, 16, 64], strides = [1, 1, 1]} : vector<1x16x256xf32> to vector<1x16x64xf32>
    %23 = vector.extract_strided_slice %15 {offsets = [0, 0, 128], sizes = [1, 16, 64], strides = [1, 1, 1]} : vector<1x16x256xf32> to vector<1x16x64xf32>
    %24 = vector.extract_strided_slice %15 {offsets = [0, 0, 192], sizes = [1, 16, 64], strides = [1, 1, 1]} : vector<1x16x256xf32> to vector<1x16x64xf32>
    %25 = vector.extract_strided_slice %16 {offsets = [0, 0, 0], sizes = [1, 16, 64], strides = [1, 1, 1]} : vector<1x16x256xf32> to vector<1x16x64xf32>
    %26 = vector.extract_strided_slice %16 {offsets = [0, 0, 64], sizes = [1, 16, 64], strides = [1, 1, 1]} : vector<1x16x256xf32> to vector<1x16x64xf32>
    %27 = vector.extract_strided_slice %16 {offsets = [0, 0, 128], sizes = [1, 16, 64], strides = [1, 1, 1]} : vector<1x16x256xf32> to vector<1x16x64xf32>
    %28 = vector.extract_strided_slice %16 {offsets = [0, 0, 192], sizes = [1, 16, 64], strides = [1, 1, 1]} : vector<1x16x256xf32> to vector<1x16x64xf32>
    %cst_17 = arith.constant dense<0.000000e+00> : vector<1x16x16xf32>
    %29 = tpu.matmul %17, %21, %cst_17 {dimension_numbers = #tpu.dot_dimension_numbers<[2], [2], [1], [1], [0, 0, 0, 1, 1, 1], [0], [0]>} : vector<1x16x64xf32>, vector<1x16x64xf32>, vector<1x16x16xf32> -> vector<1x16x16xf32>
    %cst_18 = arith.constant dense<0xFF800000> : vector<1x16xf32>
    %30 = vector.multi_reduction <maximumf>, %29, %cst_18 [2] : vector<1x16x16xf32> to vector<1x16xf32>
    %31 = vector.shape_cast %30 : vector<1x16xf32> to vector<1x16x1xf32>
    %32 = vector.broadcast %31 : vector<1x16x1xf32> to vector<1x16x16xf32>
    %33 = arith.subf %29, %32 : vector<1x16x16xf32>
    %34 = math.exp %33 : vector<1x16x16xf32>
    %cst_19 = arith.constant dense<0.000000e+00> : vector<1x16xf32>
    %35 = vector.multi_reduction <add>, %34, %cst_19 [2] : vector<1x16x16xf32> to vector<1x16xf32>
    %36 = vector.shape_cast %35 : vector<1x16xf32> to vector<1x16x1xf32>
    %37 = tpu.reciprocal %36 {approx = true} : vector<1x16x1xf32> -> vector<1x16x1xf32>
    %38 = vector.broadcast %37 : vector<1x16x1xf32> to vector<1x16x16xf32>
    %39 = arith.mulf %34, %38 : vector<1x16x16xf32>
    %cst_20 = arith.constant dense<0.000000e+00> : vector<1x16x64xf32>
    %40 = tpu.matmul %39, %25, %cst_20 {dimension_numbers = #tpu.dot_dimension_numbers<[2], [1], [1], [2], [0, 0, 0, 1, 1, 2], [0], [0]>} : vector<1x16x16xf32>, vector<1x16x64xf32>, vector<1x16x64xf32> -> vector<1x16x64xf32>
    %41 = vector.shape_cast %40 : vector<1x16x64xf32> to vector<16x64xf32>
    %c0_21 = arith.constant 0 : index
    %c0_22 = arith.constant 0 : index
    %42 = vector.load %arg11[%c0_21, %c0_22] : memref<16x256xf32, #tpu.memory_space<vmem>>, vector<16x64xf32>
    tpu.vector_store %arg11[%c0_21, %c0_22], %41 {strides = array<i32>} : memref<16x256xf32, #tpu.memory_space<vmem>>, vector<16x64xf32>,
    %cst_23 = arith.constant dense<0.000000e+00> : vector<1x16x16xf32>
    %43 = tpu.matmul %18, %22, %cst_23 {dimension_numbers = #tpu.dot_dimension_numbers<[2], [2], [1], [1], [0, 0, 0, 1, 1, 1], [0], [0]>} : vector<1x16x64xf32>, vector<1x16x64xf32>, vector<1x16x16xf32> -> vector<1x16x16xf32>
    %cst_24 = arith.constant dense<0xFF800000> : vector<1x16xf32>
    %44 = vector.multi_reduction <maximumf>, %43, %cst_24 [2] : vector<1x16x16xf32> to vector<1x16xf32>
    %45 = vector.shape_cast %44 : vector<1x16xf32> to vector<1x16x1xf32>
    %46 = vector.broadcast %45 : vector<1x16x1xf32> to vector<1x16x16xf32>
    %47 = arith.subf %43, %46 : vector<1x16x16xf32>
    %48 = math.exp %47 : vector<1x16x16xf32>
    %cst_25 = arith.constant dense<0.000000e+00> : vector<1x16xf32>
    %49 = vector.multi_reduction <add>, %48, %cst_25 [2] : vector<1x16x16xf32> to vector<1x16xf32>
    %50 = vector.shape_cast %49 : vector<1x16xf32> to vector<1x16x1xf32>
    %51 = tpu.reciprocal %50 {approx = true} : vector<1x16x1xf32> -> vector<1x16x1xf32>
    %52 = vector.broadcast %51 : vector<1x16x1xf32> to vector<1x16x16xf32>
    %53 = arith.mulf %48, %52 : vector<1x16x16xf32>
    %cst_26 = arith.constant dense<0.000000e+00> : vector<1x16x64xf32>
    %54 = tpu.matmul %53, %26, %cst_26 {dimension_numbers = #tpu.dot_dimension_numbers<[2], [1], [1], [2], [0, 0, 0, 1, 1, 2], [0], [0]>} : vector<1x16x16xf32>, vector<1x16x64xf32>, vector<1x16x64xf32> -> vector<1x16x64xf32>
    %55 = vector.shape_cast %54 : vector<1x16x64xf32> to vector<16x64xf32>
    %c0_27 = arith.constant 0 : index
    %c64 = arith.constant 64 : index
    %56 = vector.load %arg11[%c0_27, %c64] : memref<16x256xf32, #tpu.memory_space<vmem>>, vector<16x64xf32>
    tpu.vector_store %arg11[%c0_27, %c64], %55 {strides = array<i32>} : memref<16x256xf32, #tpu.memory_space<vmem>>, vector<16x64xf32>,
    %cst_28 = arith.constant dense<0.000000e+00> : vector<1x16x16xf32>
    %57 = tpu.matmul %19, %23, %cst_28 {dimension_numbers = #tpu.dot_dimension_numbers<[2], [2], [1], [1], [0, 0, 0, 1, 1, 1], [0], [0]>} : vector<1x16x64xf32>, vector<1x16x64xf32>, vector<1x16x16xf32> -> vector<1x16x16xf32>
    %cst_29 = arith.constant dense<0xFF800000> : vector<1x16xf32>
    %58 = vector.multi_reduction <maximumf>, %57, %cst_29 [2] : vector<1x16x16xf32> to vector<1x16xf32>
    %59 = vector.shape_cast %58 : vector<1x16xf32> to vector<1x16x1xf32>
    %60 = vector.broadcast %59 : vector<1x16x1xf32> to vector<1x16x16xf32>
    %61 = arith.subf %57, %60 : vector<1x16x16xf32>
    %62 = math.exp %61 : vector<1x16x16xf32>
    %cst_30 = arith.constant dense<0.000000e+00> : vector<1x16xf32>
    %63 = vector.multi_reduction <add>, %62, %cst_30 [2] : vector<1x16x16xf32> to vector<1x16xf32>
    %64 = vector.shape_cast %63 : vector<1x16xf32> to vector<1x16x1xf32>
    %65 = tpu.reciprocal %64 {approx = true} : vector<1x16x1xf32> -> vector<1x16x1xf32>
    %66 = vector.broadcast %65 : vector<1x16x1xf32> to vector<1x16x16xf32>
    %67 = arith.mulf %62, %66 : vector<1x16x16xf32>
    %cst_31 = arith.constant dense<0.000000e+00> : vector<1x16x64xf32>
    %68 = tpu.matmul %67, %27, %cst_31 {dimension_numbers = #tpu.dot_dimension_numbers<[2], [1], [1], [2], [0, 0, 0, 1, 1, 2], [0], [0]>} : vector<1x16x16xf32>, vector<1x16x64xf32>, vector<1x16x64xf32> -> vector<1x16x64xf32>
    %69 = vector.shape_cast %68 : vector<1x16x64xf32> to vector<16x64xf32>
    %c0_32 = arith.constant 0 : index
    %c128 = arith.constant 128 : index
    %70 = vector.load %arg11[%c0_32, %c128] : memref<16x256xf32, #tpu.memory_space<vmem>>, vector<16x64xf32>
    tpu.vector_store %arg11[%c0_32, %c128], %69 {strides = array<i32>} : memref<16x256xf32, #tpu.memory_space<vmem>>, vector<16x64xf32>,
    %cst_33 = arith.constant dense<0.000000e+00> : vector<1x16x16xf32>
    %71 = tpu.matmul %20, %24, %cst_33 {dimension_numbers = #tpu.dot_dimension_numbers<[2], [2], [1], [1], [0, 0, 0, 1, 1, 1], [0], [0]>} : vector<1x16x64xf32>, vector<1x16x64xf32>, vector<1x16x16xf32> -> vector<1x16x16xf32>
    %cst_34 = arith.constant dense<0xFF800000> : vector<1x16xf32>
    %72 = vector.multi_reduction <maximumf>, %71, %cst_34 [2] : vector<1x16x16xf32> to vector<1x16xf32>
    %73 = vector.shape_cast %72 : vector<1x16xf32> to vector<1x16x1xf32>
    %74 = vector.broadcast %73 : vector<1x16x1xf32> to vector<1x16x16xf32>
    %75 = arith.subf %71, %74 : vector<1x16x16xf32>
    %76 = math.exp %75 : vector<1x16x16xf32>
    %cst_35 = arith.constant dense<0.000000e+00> : vector<1x16xf32>
    %77 = vector.multi_reduction <add>, %76, %cst_35 [2] : vector<1x16x16xf32> to vector<1x16xf32>
    %78 = vector.shape_cast %77 : vector<1x16xf32> to vector<1x16x1xf32>
    %79 = tpu.reciprocal %78 {approx = true} : vector<1x16x1xf32> -> vector<1x16x1xf32>
    %80 = vector.broadcast %79 : vector<1x16x1xf32> to vector<1x16x16xf32>
    %81 = arith.mulf %76, %80 : vector<1x16x16xf32>
    %cst_36 = arith.constant dense<0.000000e+00> : vector<1x16x64xf32>
    %82 = tpu.matmul %81, %28, %cst_36 {dimension_numbers = #tpu.dot_dimension_numbers<[2], [1], [1], [2], [0, 0, 0, 1, 1, 2], [0], [0]>} : vector<1x16x16xf32>, vector<1x16x64xf32>, vector<1x16x64xf32> -> vector<1x16x64xf32>
    %83 = vector.shape_cast %82 : vector<1x16x64xf32> to vector<16x64xf32>
    %c0_37 = arith.constant 0 : index
    %c192 = arith.constant 192 : index
    %84 = vector.load %arg11[%c0_37, %c192] : memref<16x256xf32, #tpu.memory_space<vmem>>, vector<16x64xf32>
    tpu.vector_store %arg11[%c0_37, %c192], %83 {strides = array<i32>} : memref<16x256xf32, #tpu.memory_space<vmem>>, vector<16x64xf32>,
    %c0_38 = arith.constant 0 : index
    %c0_39 = arith.constant 0 : index
    %85 = vector.load %arg11[%c0_38, %c0_39] : memref<16x256xf32, #tpu.memory_space<vmem>>, vector<16x256xf32>
    %c0_40 = arith.constant 0 : index
    %c0_41 = arith.constant 0 : index
    %86 = vector.load %arg7[%c0_40, %c0_41] : memref<256x128xf32, #tpu.memory_space<vmem>>, vector<256x128xf32>
    %cst_42 = arith.constant dense<0.000000e+00> : vector<16x128xf32>
    %87 = tpu.matmul %85, %86, %cst_42 {dimension_numbers = #tpu.dot_dimension_numbers<[1], [0], [0], [1], [0, 0, 1, 1], [], []>} : vector<16x256xf32>, vector<256x128xf32>, vector<16x128xf32> -> vector<16x128xf32>
    %88 = arith.addf %87, %1 : vector<16x128xf32>
    %cst_43 = arith.constant dense<0.000000e+00> : vector<16xf32>
    %89 = vector.multi_reduction <add>, %88, %cst_43 [1] : vector<16x128xf32> to vector<16xf32>
    %90 = vector.shape_cast %89 : vector<16xf32> to vector<16x1xf32>
    %cst_44 = arith.constant 1.280000e+02 : f32
    %91 = vector.broadcast %cst_44 : f32 to vector<16x1xf32>
    %92 = arith.divf %90, %91 : vector<16x1xf32>
    %93 = vector.broadcast %92 : vector<16x1xf32> to vector<16x128xf32>
    %94 = arith.subf %88, %93 : vector<16x128xf32>
    %95 = arith.mulf %94, %94 : vector<16x128xf32>
    %cst_45 = arith.constant dense<0.000000e+00> : vector<16xf32>
    %96 = vector.multi_reduction <add>, %95, %cst_45 [1] : vector<16x128xf32> to vector<16xf32>
    %97 = vector.shape_cast %96 : vector<16xf32> to vector<16x1xf32>
    %cst_46 = arith.constant 1.280000e+02 : f32
    %98 = vector.broadcast %cst_46 : f32 to vector<16x1xf32>
    %99 = arith.divf %97, %98 : vector<16x1xf32>
    %cst_47 = arith.constant 9.99999974E-6 : f32
    %100 = vector.broadcast %cst_47 : f32 to vector<16x1xf32>
    %101 = arith.addf %99, %100 : vector<16x1xf32>
    %102 = math.rsqrt %101 : vector<16x1xf32>
    %103 = vector.broadcast %102 : vector<16x1xf32> to vector<16x128xf32>
    %104 = arith.mulf %94, %103 : vector<16x128xf32>
    %c0_48 = arith.constant 0 : index
    %c0_49 = arith.constant 0 : index
    %105 = vector.load %arg8[%c0_48, %c0_49] : memref<1x128xf32, #tpu.memory_space<vmem>>, vector<1x128xf32>
    %c0_50 = arith.constant 0 : index
    %c0_51 = arith.constant 0 : index
    %106 = vector.load %arg9[%c0_50, %c0_51] : memref<1x128xf32, #tpu.memory_space<vmem>>, vector<1x128xf32>
    %107 = vector.broadcast %105 : vector<1x128xf32> to vector<16x128xf32>
    %108 = arith.mulf %104, %107 : vector<16x128xf32>
    %109 = vector.broadcast %106 : vector<1x128xf32> to vector<16x128xf32>
    %110 = arith.addf %108, %109 : vector<16x128xf32>
    %111 = vector.shape_cast %110 : vector<16x128xf32> to vector<1x16x128xf32>
    %c0_52 = arith.constant 0 : index
    %c0_53 = arith.constant 0 : index
    %c0_54 = arith.constant 0 : index
    %112 = vector.load %arg10[%c0_52, %c0_53, %c0_54] : memref<1x16x128xf32, #tpu.memory_space<vmem>>, vector<1x16x128xf32>
    tpu.vector_store %arg10[%c0_52, %c0_53, %c0_54], %111 {strides = array<i32>} : memref<1x16x128xf32, #tpu.memory_space<vmem>>, vector<1x16x128xf32>,
    return
  }
  func.func @transform_0(%arg0: i32) -> (i32, i32, i32) {
    %c0_i32 = arith.constant 0 : i32
    %c0_i32_0 = arith.constant 0 : i32
    %c0_i32_1 = arith.constant 0 : i32
    return %arg0, %c0_i32, %c0_i32_0 : i32, i32, i32
  }
  func.func @transform_1(%arg0: i32) -> (i32, i32, i32) {
    %c0_i32 = arith.constant 0 : i32
    %c0_i32_0 = arith.constant 0 : i32
    %c0_i32_1 = arith.constant 0 : i32
    return %arg0, %c0_i32, %c0_i32_0 : i32, i32, i32
  }
  func.func @transform_2(%arg0: i32) -> (i32, i32, i32) {
    %c0_i32 = arith.constant 0 : i32
    %c0_i32_0 = arith.constant 0 : i32
    %c0_i32_1 = arith.constant 0 : i32
    return %arg0, %c0_i32, %c0_i32_0 : i32, i32, i32
  }
  func.func @transform_3(%arg0: i32) -> (i32, i32) {
    %c0_i32 = arith.constant 0 : i32
    %c0_i32_0 = arith.constant 0 : i32
    %c0_i32_1 = arith.constant 0 : i32
    return %c0_i32, %c0_i32_0 : i32, i32
  }
  func.func @transform_4(%arg0: i32) -> (i32, i32) {
    %c0_i32 = arith.constant 0 : i32
    %c0_i32_0 = arith.constant 0 : i32
    %c0_i32_1 = arith.constant 0 : i32
    return %c0_i32, %c0_i32_0 : i32, i32
  }
  func.func @transform_5(%arg0: i32) -> (i32, i32) {
    %c0_i32 = arith.constant 0 : i32
    %c0_i32_0 = arith.constant 0 : i32
    %c0_i32_1 = arith.constant 0 : i32
    return %c0_i32, %c0_i32_0 : i32, i32
  }
  func.func @transform_6(%arg0: i32) -> (i32, i32) {
    %c0_i32 = arith.constant 0 : i32
    %c0_i32_0 = arith.constant 0 : i32
    %c0_i32_1 = arith.constant 0 : i32
    return %c0_i32, %c0_i32_0 : i32, i32
  }
  func.func @transform_7(%arg0: i32) -> (i32, i32) {
    %c0_i32 = arith.constant 0 : i32
    %c0_i32_0 = arith.constant 0 : i32
    %c0_i32_1 = arith.constant 0 : i32
    return %c0_i32, %c0_i32_0 : i32, i32
  }
  func.func @transform_8(%arg0: i32) -> (i32, i32) {
    %c0_i32 = arith.constant 0 : i32
    %c0_i32_0 = arith.constant 0 : i32
    %c0_i32_1 = arith.constant 0 : i32
    return %c0_i32, %c0_i32_0 : i32, i32
  }
  func.func @transform_9(%arg0: i32) -> (i32, i32, i32) {
    %c0_i32 = arith.constant 0 : i32
    %c0_i32_0 = arith.constant 0 : i32
    %c0_i32_1 = arith.constant 0 : i32
    return %arg0, %c0_i32, %c0_i32_0 : i32, i32, i32
  }
}

</mosaic_0001>

<bundles_post_ra>
// kernel: _mha_distinct.1
= control target key start
LH: loop header
LB: loop body
LE: loop exit
PB: predicated region body
PF: predicated region fallthrough
CT: control target
= control target key end

     0   :  { %s3076_s0 = inlined_call_operand.hbm [shape: f32[2,16,128], index: 0, kind: input, shape index: {}]   ;;  %s3077_s1 = inlined_call_operand.hbm [shape: f32[2,16,128], index: 1, kind: input, shape index: {}]   ;;  %s3078_s2 = inlined_call_operand.hbm [shape: f32[2,16,128], index: 2, kind: input, shape index: {}]   ;;  %s3079_s3 = inlined_call_operand.hbm [shape: f32[128,256], index: 3, kind: input, shape index: {}]   ;;  %s3080_s4 = inlined_call_operand.hbm [shape: f32[128,256], index: 4, kind: input, shape index: {}]   ;;  %s3081_s5 = inlined_call_operand.hbm [shape: f32[128,256], index: 5, kind: input, shape index: {}]   ;;  %s3082_s6 = inlined_call_operand.hbm [shape: f32[256,128], index: 6, kind: input, shape index: {}]   ;;  %s3083_s7 = inlined_call_operand.vmem [shape: f32[1,128], index: 7, kind: input, shape index: {}]   ;;  %s3084_s8 = inlined_call_operand.vmem [shape: f32[1,128], index: 8, kind: input, shape index: {}]   ;;  %s3085_s9 = inlined_call_operand.hbm [shape: f32[2,16,128], index: 9, kind: output, shape index: {}]  }
   0x1   :  { %3103 = sst [smem:[#allocation26_spill]] %s3076_s0 }
   0x2   :  { %3104 = sst [smem:[#allocation27_spill]] %s3079_s3 }
   0x3   :  { %3105 = sst [smem:[#allocation28_spill]] %s3081_s5 }
   0x4   :  { %14 = vsyncpa [#allocation4], 0 }
   0x5   :  { %16 = vsyncpa [#allocation4 + $0x1], 0 }
   0x6   :  { %17 = vsyncpa [#allocation7], 0 }
   0x7   :  { %19 = vsyncpa [#allocation7 + $0x1], 0 }
   0x8   :  { %20 = vsyncpa [#allocation10], 0 }
   0x9   :  { %21 = vsyncpa [#allocation13], 0 }
   0xa   :  { %22 = vsyncpa [#allocation5], 0 }
   0xb   :  { %24 = vsyncpa [#allocation5 + $0x1], 0  ;;  %s2615_s30 = smov 0   ;;  %s2617_s10 = smov 0  }
   0xc   :  { %s2619_s11 = smov 0   ;;  %s2621_s12 = smov 0  }
   0xd LB: > { %3106 = sst [smem:[#allocation21_spill]] %s2535_s30  ;;  %s2636_s13 = sadd.s32 4294967295, %s2547_s12   ;;  %s2547_s12 = sphi %s2621_s12, %s3140_s12   ;;  %s2543_s11 = sphi %s2619_s11, %s3144_s11   ;;  %s2539_s10 = sphi %s2617_s10, %s3143_s10   ;;  %s2535_s30 = sphi %s2615_s30, %s3142_s30  }
   0xe   : > { %3107 = sst [smem:[#allocation22_spill]] %s2547_s12  ;;  %s1956_s14 = sadd.s32 4294967294, %s2547_s12  }
   0xf   : > { %p50_p0 = scmp.ne.s32.totalorder %s2539_s10, %s2535_s30  ;;  %p3093_p1 = scmp.eq.s32.totalorder %s2636_s13, 0 }
  0x10   : > { %p252_p2 = scmp.eq.s32.totalorder %s2636_s13, 1  ;;  %p258_p3 = scmp.eq.s32.totalorder %s1956_s14, 1 }
  0x11   : > { %p2645_p4 = por %p3093_p1, %p50_p0  ;;  %p1957_p5 = scmp.ge.s32.totalorder %s2547_s12, 1 }
  0x12   : > { %p2650_p6 = por %p258_p3, %p50_p0  ;;  %p265_p7 = scmp.lt.s32.totalorder %s2547_s12, 3 }
  0x13   : > { %s3108_s15 = scalar_select %p2645_p4, 1, 0 }
  0x14   : > { %s3109_s16 = scalar_select %p2650_p6, 1, 0 }
  0x15   : > { %p2655_p8 = pnand %p1957_p5, %p265_p7  ;;  %s2549_s18 = smov [#allocation9]  }
  0x16   : > { %3110 = sst [smem:[#allocation23_spill]] %s3109_s16  ;;  %s277_s19 = sshll.u32 %s2549_s18, 4  ;;  %s278_s19 = int_to_ptr.vmem [resolvable:$true] %s277_s19 }
  0x17   : > { %s3111_s17 = scalar_select %p2655_p8, 1, 0 }
  0x18   : > { %p2166_p9 = pneg %p2655_p8  ;;  %s2550_s21 = smov [#allocation12]  }
  0x19   : > { %s303_s22 = sshll.u32 %s2550_s21, 4  ;;  %s2294_s23 = scalar_lea.vmem %s278_s19, 4096  ;;  %s304_s22 = int_to_ptr.vmem [resolvable:$true] %s303_s22 }
  0x1a   : > { %p2664_p11 = pnand %p2166_p9, %p3093_p1  ;;  %p2295_p13 = scmp.ne.s32.totalorder %s278_s19, %s2294_s23 }
  0x1b   : > { %p2302_p5 = scmp.lt.s32.totalorder %s278_s19, %s278_s19  ;;  %p2303_p7 = scmp.lt.s32.totalorder %s2294_s23, %s2294_s23 }
  0x1c   : > { %s3112_s20 = scalar_select %p2664_p11, 1, 0 }
  0x1d   : > { %p3094_p12 = pneg %p2664_p11  ;;  %p2304_p10 = por %p2303_p7, %p2302_p5 }
  0x1f   : > { %p2297_p0 = pnand %p2295_p13, %p3094_p12 }
  0x21   : > { %p2298_p3 = pneg %p2297_p0 }
  0x23   : > { %p2305_p9 = pnand %p2304_p10, %p2298_p3 }
  0x25   : > { %2308 = shalt.err (!%p2305_p9)
}
  0x26   : > { %s3086_s24 = smov 256   ;;  %s3088_s25 = smov 16  }
  0x27   : > { %s3113_s3 = sld [smem:[#allocation27_spill]]  ;;  %s2320_s28 = scalar_lea.vmem %s304_s22, 4096 }
  0x28   : > { %p2321_p13 = scmp.ne.s32.totalorder %s304_s22, %s2320_s28  ;;  %p2328_p10 = scmp.lt.s32.totalorder %s304_s22, %s304_s22 }
  0x29   : > { %p2329_p3 = scmp.lt.s32.totalorder %s2320_s28, %s2320_s28 }
  0x2a   : > { %p2323_p0 = pnand %p2321_p13, %p3094_p12 }
  0x2b   : > { %p2330_p7 = por %p2329_p3, %p2328_p10 }
  0x2c   : > { %p2324_p5 = pneg %p2323_p0 }
  0x2d   : > { %2169 = dma.hbm_to_vmem [thread:$0]  (!%p2664_p11), %s3113_s3, 4096, %s278_s19, [#allocation10], %s3086_s24, %s3086_s24, %s3088_s25  }
  0x2e   : > { %p2331_p9 = pnand %p2330_p7, %p2324_p5 }
  0x30   : > { %2334 = shalt.err (!%p2331_p9)
}
  0x31   : > { %s3114_s5 = sld [smem:[#allocation28_spill]]  ;;  %s2693_s18 = sadd.s32 1, %s2547_s12  }
  0x32   : > { %3115 = sst [smem:[#allocation24_spill]] %s2693_s18  ;;  %s37_s19 = sadd.s32 1, %s2543_s11 }
  0x33   : > { %s34_s21 = ssub.s32 %s2547_s12, %s2693_s18  ;;  %p44_p13 = scmp.ne.s32.totalorder %s2543_s11, %s2539_s10 }
  0x34   : > { %p35_p0 = scmp.eq.s32.totalorder %s34_s21, 0  ;;  %p45_p5 = scmp.eq.s32.totalorder %s2547_s12, 0 }
  0x35   : > { %p2703_p10 = por %p252_p2, %p44_p13  ;;  %p2197_p7 = scmp.lt.s32.totalorder %s2547_s12, 2 }
  0x36   : > { %s2708_s26 = scalar_select %p35_p0, %s2543_s11, %s37_s19  }
  0x37   : > { %2175 = dma.hbm_to_vmem [thread:$0]  (!%p2664_p11), %s3114_s5, 4096, %s304_s22, [#allocation13], %s3086_s24, %s3086_s24, %s3088_s25  }
  0x38   : > { %s3116_s23 = scalar_select %p2703_p10, 1, 0 }
  0x39   : > { %3117 = sst [smem:[#allocation25_spill]] %s2708_s26  ;;  %p46_p3 = por %p45_p5, %p44_p13 }
  0x3a   : > { %s3087_s27 = sand.u32 1, %s2543_s11   ;;  %s2717_s28 = sshll.u32 %s2547_s12, 8 }
  0x3b   : > { %s2714_s22 = sshll.u32 %s3087_s27, 4  ;;  %p2719_p9 = pnand %p2197_p7, %p46_p3 }
  0x3c   : > { %s357_s14 = sand.u32 1, %s2547_s12   ;;  %s2728_s19 = scalar_lea.hbm %s3077_s1, %s2717_s28 }
  0x3d   : > { %s361_s27 = scalar_lea.vmem [#allocation6], %s2714_s22  ;;  %s2553_s3 = smov [#allocation11]  }
  0x3e   : > { %s368_s25 = sshll.u32 %s361_s27, 4  ;;  %s2733_s5 = sshll.u32 %s2553_s3, 4  ;;  %s2731_s25 = int_to_ptr.vmem [resolvable:$true] %s368_s25  ;;  %s291_s5 = int_to_ptr.vmem [resolvable:$true] %s2733_s5 }
  0x3f   : > { %s2735_s26 = scalar_lea.sflag [#allocation7], %s357_s14  ;;  %s2335_s18 = scalar_lea.hbm %s2728_s19, 256 }
  0x40   : > { %p2336_p2 = scmp.ne.s32.totalorder %s2728_s19, %s2335_s18  ;;  %p2741_p13 = pneg %p2719_p9 }
  0x41   : > { %s2340_s21 = scalar_lea.hbm %s3077_s1, 512  ;;  %p2341_p3 = scmp.lt.s32.totalorder %s2728_s19, %s3077_s1 }
  0x42   : > { %p2338_p0 = pnand %p2741_p13, %p2336_p2  ;;  %p2342_p7 = scmp.lt.s32.totalorder %s2340_s21, %s2335_s18 }
  0x44   : > { %p2339_p5 = pneg %p2338_p0  ;;  %p2343_p1 = por %p2342_p7, %p2341_p3 }
  0x46   : > { %p2344_p12 = pnand %p2343_p1, %p2339_p5 }
  0x48   : > { %2347 = shalt.err (!%p2344_p12)
}
  0x49   : > { %s2348_s14 = scalar_lea.vmem %s2731_s25, 256  ;;  %s2554_s30 = smov [#allocation6]  }
  0x4a   : > { %p2349_p6 = scmp.ne.s32.totalorder %s2731_s25, %s2348_s14  ;;  %s2353_s24 = sshll.u32 %s2554_s30, 4  ;;  %s2354_s24 = int_to_ptr.vmem [resolvable:$false] %s2353_s24 }
  0x4b   : > { %s2355_s27 = scalar_lea.vmem %s2354_s24, 512  ;;  %p2356_p10 = scmp.lt.s32.totalorder %s2731_s25, %s2354_s24 }
  0x4c   : > { %p2351_p2 = pnand %p2349_p6, %p2741_p13  ;;  %p2357_p4 = scmp.lt.s32.totalorder %s2355_s27, %s2348_s14 }
  0x4e   : > { %p2352_p0 = pneg %p2351_p2  ;;  %p2358_p8 = por %p2357_p4, %p2356_p10 }
  0x50   : > { %p2359_p11 = pnand %p2358_p8, %p2352_p0 }
  0x52   : > { %2362 = shalt.err (!%p2359_p11)
}
  0x53   : > { %s3101_s16 = smov 128   ;;  %s2556_s18 = smov 8  }
  0x54   : > { %2185 = dma.hbm_to_vmem [thread:$0]  (!%p2719_p9), %s2728_s19, 256, %s2731_s25, %s2735_s26, %s3101_s16, %s3101_s16, %s2556_s18  }
  0x55   : > { %s2374_s30 = scalar_lea.vmem %s291_s5, 4096  ;;  %p3120_p6 = scmp.ne.s32.totalorder %s3112_s20, 0 }
  0x56   : > { %p2375_p1 = scmp.ne.s32.totalorder %s291_s5, %s2374_s30  ;;  %p2382_p12 = scmp.lt.s32.totalorder %s291_s5, %s291_s5 }
  0x57   : > { %p3121_p4 = pneg %p3120_p6  ;;  %p2383_p10 = scmp.lt.s32.totalorder %s2374_s30, %s2374_s30 }
  0x59   : > { %p2377_p8 = pnand %p2375_p1, %p3121_p4  ;;  %p2384_p5 = por %p2383_p10, %p2382_p12 }
  0x5b   : > { %p2378_p11 = pneg %p2377_p8 }
  0x5d   : > { %p2385_p3 = pnand %p2384_p5, %p2378_p11 }
  0x5f   : > { %2388 = shalt.err (!%p2385_p3)
}
  0x60   : > { %s3122_s21 = smov 16   ;;  %s3123_s3 = smov 256  }
  0x61   : > { %2172 = dma.hbm_to_vmem [thread:$0]  (!%p3120_p6), %s3080_s4, 4096, %s291_s5, [#allocation10], %s3123_s3, %s3123_s3, %s3122_s21  }
  0x62   : > { %s2557_s25 = smov [#allocation14]   ;;  %p3124_p2 = pmov %p3121_p4 }
  0x63   : > { %s316_s19 = sshll.u32 %s2557_s25, 4  ;;  %s317_s19 = int_to_ptr.vmem [resolvable:$true] %s316_s19 }
  0x64   : > { %s2400_s27 = scalar_lea.vmem %s317_s19, 4096  ;;  %p2408_p4 = scmp.lt.s32.totalorder %s317_s19, %s317_s19 }
  0x65   : > { %p2401_p7 = scmp.ne.s32.totalorder %s317_s19, %s2400_s27  ;;  %p2409_p8 = scmp.lt.s32.totalorder %s2400_s27, %s2400_s27 }
  0x67   : > { %p2403_p0 = pnand %p2401_p7, %p3124_p2  ;;  %p2410_p11 = por %p2409_p8, %p2408_p4 }
  0x69   : > { %p2404_p1 = pneg %p2403_p0 }
  0x6b   : > { %p2411_p12 = pnand %p2410_p11, %p2404_p1 }
  0x6d   : > { %2414 = shalt.err (!%p2411_p12)
}
  0x6e   : > { %2178 = dma.hbm_to_vmem [thread:$0]  (!%p3120_p6), %s3082_s6, 4096, %s317_s19, [#allocation13], %s3101_s16, %s3101_s16, %s2556_s18  }
  0x6f   : > { %s3125_s0 = sld [smem:[#allocation26_spill]]  ;;  %s340_s20 = scalar_lea.vmem [#allocation3], %s2714_s22 }
  0x70   : > { %s347_s24 = sshll.u32 %s340_s20, 4  ;;  %s3126_s25 = sand.u32 1, %s2543_s11   ;;  %s2797_s24 = int_to_ptr.vmem [resolvable:$true] %s347_s24 }
  0x71   : > { %s337_s27 = scalar_lea.sflag [#allocation4], %s3126_s25 }
  0x75   : > { %s2794_s14 = scalar_lea.hbm %s3125_s0, %s2717_s28  ;;  %s2420_s21 = scalar_lea.hbm %s3125_s0, 512 }
  0x76   : > { %s2415_s5 = scalar_lea.hbm %s2794_s14, 256  ;;  %p2421_p6 = scmp.lt.s32.totalorder %s2794_s14, %s3125_s0 }
  0x77   : > { %p2416_p10 = scmp.ne.s32.totalorder %s2794_s14, %s2415_s5  ;;  %p2422_p7 = scmp.lt.s32.totalorder %s2420_s21, %s2415_s5 }
  0x79   : > { %p2418_p5 = pnand %p2416_p10, %p2741_p13  ;;  %p2423_p2 = por %p2422_p7, %p2421_p6 }
  0x7b   : > { %p2419_p3 = pneg %p2418_p5 }
  0x7d   : > { %p2424_p0 = pnand %p2423_p2, %p2419_p3 }
  0x7f   : > { %2427 = shalt.err (!%p2424_p0)
}
  0x80   : > { %s2428_s20 = scalar_lea.vmem %s2797_s24, 256  ;;  %s2558_s25 = smov [#allocation3]  }
  0x81   : > { %p2429_p1 = scmp.ne.s32.totalorder %s2797_s24, %s2428_s20  ;;  %s2433_s19 = sshll.u32 %s2558_s25, 4  ;;  %s2434_s19 = int_to_ptr.vmem [resolvable:$false] %s2433_s19 }
  0x82   : > { %s2435_s30 = scalar_lea.vmem %s2434_s19, 512  ;;  %p2436_p11 = scmp.lt.s32.totalorder %s2797_s24, %s2434_s19 }
  0x83   : > { %p2431_p4 = pnand %p2429_p1, %p2741_p13  ;;  %p2437_p12 = scmp.lt.s32.totalorder %s2435_s30, %s2428_s20 }
  0x85   : > { %p2432_p8 = pneg %p2431_p4  ;;  %p2438_p10 = por %p2437_p12, %p2436_p11 }
  0x87   : > { %p2439_p5 = pnand %p2438_p10, %p2432_p8 }
  0x89   : > { %2442 = shalt.err (!%p2439_p5)
}
  0x8a   : > { %s3127_s16 = smov 128   ;;  %s2828_s3 = scalar_lea.hbm %s3078_s2, %s2717_s28 }
  0x8b   : > { %2182 = dma.hbm_to_vmem [thread:$0]  (!%p2719_p9), %s2794_s14, 256, %s2797_s24, %s337_s27, %s3127_s16, %s3127_s16, %s2556_s18  }
  0x8c   : > { %s382_s20 = scalar_lea.vmem [#allocation8], %s2714_s22  ;;  %s2443_s19 = scalar_lea.hbm %s2828_s3, 256 }
  0x8d   : > { %s389_s25 = sshll.u32 %s382_s20, 4  ;;  %p2444_p3 = scmp.ne.s32.totalorder %s2828_s3, %s2443_s19  ;;  %s390_s25 = int_to_ptr.vmem [resolvable:$true] %s389_s25 }
  0x8e   : > { %s2448_s14 = scalar_lea.hbm %s3078_s2, 512  ;;  %p2449_p2 = scmp.lt.s32.totalorder %s2828_s3, %s3078_s2 }
  0x8f   : > { %p2446_p6 = pnand %p2444_p3, %p2741_p13  ;;  %p2450_p0 = scmp.lt.s32.totalorder %s2448_s14, %s2443_s19 }
  0x91   : > { %p2447_p7 = pneg %p2446_p6  ;;  %p2451_p1 = por %p2450_p0, %p2449_p2 }
  0x93   : > { %p2452_p4 = pnand %p2451_p1, %p2447_p7 }
  0x95   : > { %2455 = shalt.err (!%p2452_p4)
}
  0x96   : > { %s2456_s22 = scalar_lea.vmem %s390_s25, 256  ;;  %s2559_s28 = smov [#allocation8]  }
  0x97   : > { %p2457_p8 = scmp.ne.s32.totalorder %s390_s25, %s2456_s22  ;;  %s2461_s5 = sshll.u32 %s2559_s28, 4  ;;  %s2462_s5 = int_to_ptr.vmem [resolvable:$false] %s2461_s5 }
  0x98   : > { %s2463_s21 = scalar_lea.vmem %s2462_s5, 512  ;;  %p2464_p10 = scmp.lt.s32.totalorder %s390_s25, %s2462_s5 }
  0x99   : > { %p2459_p11 = pnand %p2457_p8, %p2741_p13  ;;  %p2465_p5 = scmp.lt.s32.totalorder %s2463_s21, %s2456_s22 }
  0x9b   : > { %p2460_p12 = pneg %p2459_p11  ;;  %p2466_p3 = por %p2465_p5, %p2464_p10 }
  0x9d   : > { %p2467_p6 = pnand %p2466_p3, %p2460_p12 }
  0x9f   : > { %2470 = shalt.err (!%p2467_p6)
}
  0xa0   : > { %2188 = dma.hbm_to_vmem [thread:$0]  (!%p2719_p9), %s2828_s3, 256, %s390_s25, %s2735_s26, %s3127_s16, %s3127_s16, %s2556_s18  }
  0xa1   : > { %p3128_p13 = scmp.ne.s32.totalorder %s3111_s17, 0 }
  0xa2   : > { %s2854_s0 = sand.u32 (!%p3128_p13), 1, %s2539_s10   ;;  %p3129_p7 = scmp.ne.s32.totalorder (!%p3128_p13), %s3108_s15, 0 }
  0xa3   : > { %401 = sbr.rel (%p3128_p13) target bundleno = 3331 (0xd03), region = 56  ;;  %s2857_s12 = sshll.u32 (!%p3128_p13), %s2854_s0, 4 }
  0xa4   : > { %s404_s20 = scalar_lea.sflag (!%p3128_p13), [#allocation4], %s2854_s0  ;;  %s407_s29 = scalar_lea.vmem (!%p3128_p13), [#allocation3], %s2857_s12 }
  0xa8   : > { %2514 = dma.done.wait (%p3129_p7), %s404_s20, 256  }
  0xa9   : > { %2516 = vsyncadd (%p3129_p7), %s404_s20, 4294967040  ;;  %s412_s17 = sand.u32 1, %s2636_s13   ;;  %s416_s18 = scalar_lea.vmem [#allocation6], %s2857_s12 }
  0xaa   : > { %s413_s26 = scalar_lea.sflag [#allocation7], %s412_s17 }
  0xab   : > { %2518 = dma.done.wait (%p3129_p7), %s413_s26, 512  }
  0xac   : > { %2520 = vsyncadd (%p3129_p7), %s413_s26, 4294966784  ;;  %s425_s16 = scalar_lea.vmem [#allocation8], %s2857_s12  ;;  %p3130_p9 = scmp.eq.s32.totalorder %s2636_s13, 0 }
  0xae   : > { %2522 = dma.done.wait (%p3130_p9), [#allocation10], 8192   ;;  %p3131_p2 = pmov %p3130_p9 }
  0xb0   : > { %2524 = vsyncadd (%p3131_p2), [#allocation10], 4294959104  ;;  %p3132_p0 = pmov %p3131_p2 }
  0xb2   : > { %2526 = dma.done.wait (%p3132_p0), [#allocation13], 8192   ;;  %p3133_p1 = pmov %p3132_p0 }
  0xb3   : > { %v2560_v0 = vmov 0.0   ;;  %v632_v1 = vld [vmem:[#allocation11 + $0xf8] sm:$0xff]  ;;  %v631_v2 = vld [vmem:[#allocation11 + $0xf0] sm:$0xff]  ;;  %v630_v3 = vld [vmem:[#allocation11 + $0xe8] sm:$0xff]  ;;  %s2561_s15 = smov 64   ;;  %vm823_vm0 = vcmask 523264  }
  0xb4   : > { %2528 = vsyncadd (%p3133_p1), [#allocation13], 4294959104  ;;  %697 = vmatprep.mubr.f32.mxu1 %v2560_v0  ;;  %588 = vmatprep.mubr.f32.mxu0 %v2560_v0  ;;  %v629_v4 = vld [vmem:[#allocation11 + $0xe0] sm:$0xff]  ;;  %v523_v5 = vld [vmem:[#allocation9 + $0xf8] sm:$0xff]  ;;  %vm911_vm1 = vcmask 130048   ;;  %vm1227_vm2 = vcmask 1048064  }
  0xb5   : > { %633 = vmatprep.subr.mxu1 %v632_v1  ;;  %v628_v6 = vld [vmem:[#allocation11 + $0xd8] sm:$0xff]  ;;  %524 = vmatprep.subr.mxu0 %v523_v5  ;;  %v522_v7 = vld [vmem:[#allocation9 + $0xf0] sm:$0xff]  ;;  %v521_v9 = vld [vmem:[#allocation9 + $0xe8] sm:$0xff]  ;;  %s2015_s14 = sshll.u32 %s2636_s13, 8  ;;  %s485_s24 = scalar_lea.vmem [#allocation15], %s2857_s12 }
  0xb6   : > { %634 = vmatpush1.msra.mxu1 %v631_v2  ;;  %v627_v8 = vld [vmem:[#allocation11 + $0xd0] sm:$0xff]  ;;  %525 = vmatpush1.msra.mxu0 %v522_v7  ;;  %v520_v10 = vld [vmem:[#allocation9 + $0xe0] sm:$0xff]  ;;  %v626_v11 = vld [vmem:[#allocation11 + $0xc8] sm:$0xff]  ;;  %s1802_s27 = sshll.u32 %s485_s24, 4  ;;  %s3031_s5 = scalar_lea.hbm %s3085_s9, %s2015_s14  ;;  %s3033_s27 = int_to_ptr.vmem [resolvable:$true] %s1802_s27 }
  0xb7   : > { %635 = vmatprep.subr.mxu1 %v630_v3  ;;  %526 = vmatprep.subr.mxu0 %v521_v9  ;;  %v519_v12 = vld [vmem:[#allocation9 + $0xd8] sm:$0xff]  ;;  %v625_v13 = vld [vmem:[#allocation11 + $0xc0] sm:$0xff]  ;;  %v518_v14 = vld [vmem:[#allocation9 + $0xd0] sm:$0xff]  ;;  %s1789_s21 = scalar_lea.sflag [#allocation5], %s2854_s0  ;;  %s2471_s20 = scalar_lea.vmem %s3033_s27, 256 }
  0xb8   : > { %636 = vmatpush1.msra.mxu1 %v629_v4  ;;  %527 = vmatpush1.msra.mxu0 %v520_v10  ;;  %v517_v15 = vld [vmem:[#allocation9 + $0xc8] sm:$0xff]  ;;  %v624_v16 = vld [vmem:[#allocation11 + $0xb8] sm:$0xff]  ;;  %v516_v17 = vld [vmem:[#allocation9 + $0xc0] sm:$0xff]  ;;  %p2472_p4 = scmp.ne.s32.totalorder %s3033_s27, %s2471_s20  ;;  %p3134_p8 = scmp.ne.s32.totalorder %s3116_s23, 0 }
  0xb9   : > { %637 = vmatprep.subr.mxu1 %v628_v6  ;;  %528 = vmatprep.subr.mxu0 %v519_v12  ;;  %v623_v18 = vld [vmem:[#allocation11 + $0xb0] sm:$0xff]  ;;  %v515_v19 = vld [vmem:[#allocation9 + $0xb8] sm:$0xff]  ;;  %v622_v20 = vld [vmem:[#allocation11 + $0xa8] sm:$0xff]  ;;  %s2562_s13 = smov [#allocation15]  }
  0xba   : > { %638 = vmatpush1.msra.mxu1 %v627_v8  ;;  %529 = vmatpush1.msra.mxu0 %v518_v14  ;;  %v514_v21 = vld [vmem:[#allocation9 + $0xb0] sm:$0xff]  ;;  %v621_v22 = vld [vmem:[#allocation11 + $0xa0] sm:$0xff]  ;;  %v513_v23 = vld [vmem:[#allocation9 + $0xa8] sm:$0xff]  ;;  %p2473_p11 = pnand %p2472_p4, %p3134_p8  ;;  %s2475_s12 = sshll.u32 %s2562_s13, 4  ;;  %s2476_s12 = int_to_ptr.vmem [resolvable:$false] %s2475_s12 }
  0xbb   : > { %639 = vmatprep.subr.mxu1 %v626_v11  ;;  %530 = vmatprep.subr.mxu0 %v517_v15  ;;  %v620_v24 = vld [vmem:[#allocation11 + $0x98] sm:$0xff]  ;;  %v512_v25 = vld [vmem:[#allocation9 + $0xa0] sm:$0xff]  ;;  %v619_v26 = vld [vmem:[#allocation11 + $0x90] sm:$0xff]  ;;  %p2478_p10 = scmp.lt.s32.totalorder %s3033_s27, %s2476_s12 }
  0xbc   : > { %640 = vmatpush1.msra.mxu1 %v625_v13  ;;  %531 = vmatpush1.msra.mxu0 %v516_v17  ;;  %v511_v27 = vld [vmem:[#allocation9 + $0x98] sm:$0xff]  ;;  %v618_v28 = vld [vmem:[#allocation11 + $0x88] sm:$0xff]  ;;  %v510_v29 = vld [vmem:[#allocation9 + $0x90] sm:$0xff]  ;;  %p2474_p12 = pneg %p2473_p11 }
  0xbd   : > { %641 = vmatprep.subr.mxu1 %v624_v16  ;;  %532 = vmatprep.subr.mxu0 %v515_v19  ;;  %v617_v30 = vld [vmem:[#allocation11 + $0x80] sm:$0xff]  ;;  %v509_v31 = vld [vmem:[#allocation9 + $0x88] sm:$0xff]  ;;  %v616_v32 = vld [vmem:[#allocation11 + $0x78] sm:$0xff] }
  0xbe   : > { %642 = vmatpush1.msra.mxu1 %v623_v18  ;;  %533 = vmatpush1.msra.mxu0 %v514_v21  ;;  %v508_v33 = vld [vmem:[#allocation9 + $0x80] sm:$0xff]  ;;  %v615_v34 = vld [vmem:[#allocation11 + $0x70] sm:$0xff]  ;;  %v507_v35 = vld [vmem:[#allocation9 + $0x78] sm:$0xff] }
  0xbf   : > { %643 = vmatprep.subr.mxu1 %v622_v20  ;;  %534 = vmatprep.subr.mxu0 %v513_v23  ;;  %v614_v36 = vld [vmem:[#allocation11 + $0x68] sm:$0xff]  ;;  %v506_v37 = vld [vmem:[#allocation9 + $0x70] sm:$0xff]  ;;  %v613_v38 = vld [vmem:[#allocation11 + $0x60] sm:$0xff] }
  0xc0   : > { %644 = vmatpush1.msra.mxu1 %v621_v22  ;;  %535 = vmatpush1.msra.mxu0 %v512_v25  ;;  %v505_v39 = vld [vmem:[#allocation9 + $0x68] sm:$0xff]  ;;  %v612_v40 = vld [vmem:[#allocation11 + $0x58] sm:$0xff]  ;;  %v504_v41 = vld [vmem:[#allocation9 + $0x60] sm:$0xff] }
  0xc1   : > { %645 = vmatprep.subr.mxu1 %v620_v24  ;;  %536 = vmatprep.subr.mxu0 %v511_v27  ;;  %v611_v42 = vld [vmem:[#allocation11 + $0x50] sm:$0xff]  ;;  %v503_v43 = vld [vmem:[#allocation9 + $0x58] sm:$0xff]  ;;  %v610_v44 = vld [vmem:[#allocation11 + $0x48] sm:$0xff] }
  0xc2   : > { %646 = vmatpush1.msra.mxu1 %v619_v26  ;;  %537 = vmatpush1.msra.mxu0 %v510_v29  ;;  %v502_v45 = vld [vmem:[#allocation9 + $0x50] sm:$0xff]  ;;  %v609_v46 = vld [vmem:[#allocation11 + $0x40] sm:$0xff]  ;;  %v501_v47 = vld [vmem:[#allocation9 + $0x48] sm:$0xff] }
  0xc3   : > { %647 = vmatprep.subr.mxu1 %v618_v28  ;;  %538 = vmatprep.subr.mxu0 %v509_v31  ;;  %v608_v48 = vld [vmem:[#allocation11 + $0x38] sm:$0xff]  ;;  %v500_v49 = vld [vmem:[#allocation9 + $0x40] sm:$0xff]  ;;  %v607_v50 = vld [vmem:[#allocation11 + $0x30] sm:$0xff] }
  0xc4   : > { %648 = vmatpush1.msra.mxu1 %v617_v30  ;;  %539 = vmatpush1.msra.mxu0 %v508_v33  ;;  %v499_v51 = vld [vmem:[#allocation9 + $0x38] sm:$0xff]  ;;  %v606_v52 = vld [vmem:[#allocation11 + $0x28] sm:$0xff]  ;;  %v498_v53 = vld [vmem:[#allocation9 + $0x30] sm:$0xff] }
  0xc5   : > { %649 = vmatprep.subr.mxu1 %v616_v32  ;;  %540 = vmatprep.subr.mxu0 %v507_v35  ;;  %v605_v54 = vld [vmem:[#allocation11 + $0x20] sm:$0xff]  ;;  %v497_v55 = vld [vmem:[#allocation9 + $0x28] sm:$0xff]  ;;  %v604_v56 = vld [vmem:[#allocation11 + $0x18] sm:$0xff] }
  0xc6   : > { %650 = vmatpush1.msra.mxu1 %v615_v34  ;;  %541 = vmatpush1.msra.mxu0 %v506_v37  ;;  %v496_v57 = vld [vmem:[#allocation9 + $0x20] sm:$0xff]  ;;  %v603_v58 = vld [vmem:[#allocation11 + $0x10] sm:$0xff]  ;;  %v495_v59 = vld [vmem:[#allocation9 + $0x18] sm:$0xff] }
  0xc7   : > { %651 = vmatprep.subr.mxu1 %v614_v36  ;;  %542 = vmatprep.subr.mxu0 %v505_v39  ;;  %v602_v60 = vld [vmem:[#allocation11 + $0x8] sm:$0xff]  ;;  %v494_v61 = vld [vmem:[#allocation9 + $0x10] sm:$0xff]  ;;  %v601_v62 = vld [vmem:[#allocation11] sm:$0xff] }
  0xc8   : > { %652 = vmatpush1.msra.mxu1 %v613_v38  ;;  %543 = vmatpush1.msra.mxu0 %v504_v41  ;;  %v493_v63 = vld [vmem:[#allocation9 + $0x8] sm:$0xff]  ;;  %v488_v1 = vld [vmem:[%s416_s18] sm:$0xff]  ;;  %v741_v6 = vld [vmem:[#allocation12 + $0xf8] sm:$0xff] }
  0xc9   : > { %653 = vmatprep.subr.mxu1 %v612_v40  ;;  %544 = vmatprep.subr.mxu0 %v503_v43  ;;  %v492_v2 = vld [vmem:[#allocation9] sm:$0xff]  ;;  %v489_v4 = vld [vmem:[%s416_s18 + $0x8] sm:$0xff]  ;;  %v740_v7 = vld [vmem:[#allocation12 + $0xf0] sm:$0xff] }
  0xca   : > { %654 = vmatpush1.msra.mxu1 %v611_v42  ;;  %545 = vmatpush1.msra.mxu0 %v502_v45  ;;  %v2886_v3 = vld [vmem:[%s407_s29] sm:$0xff]  ;;  %v2895_v5 = vld [vmem:[%s407_s29 + $0x8] sm:$0xff]  ;;  %s2477_s29 = scalar_lea.vmem %s2476_s12, 512 }
  0xcb   : > { %655 = vmatprep.subr.mxu1 %v610_v44  ;;  %546 = vmatprep.subr.mxu0 %v501_v47  ;;  %v739_v8 = vld [vmem:[#allocation12 + $0xe8] sm:$0xff]  ;;  %v738_v9 = vld [vmem:[#allocation12 + $0xe0] sm:$0xff]  ;;  %v737_v10 = vld [vmem:[#allocation12 + $0xd8] sm:$0xff]  ;;  %p2479_p5 = scmp.lt.s32.totalorder %s2477_s29, %s2471_s20 }
  0xcc   : > { %656 = vmatpush1.msra.mxu1 %v609_v46  ;;  %547 = vmatpush1.msra.mxu0 %v500_v49  ;;  %v736_v11 = vld [vmem:[#allocation12 + $0xd0] sm:$0xff]  ;;  %v735_v12 = vld [vmem:[#allocation12 + $0xc8] sm:$0xff]  ;;  %v734_v13 = vld [vmem:[#allocation12 + $0xc0] sm:$0xff] }
  0xcd   : > { %657 = vmatprep.subr.mxu1 %v608_v48  ;;  %548 = vmatprep.subr.mxu0 %v499_v51  ;;  %v733_v14 = vld [vmem:[#allocation12 + $0xb8] sm:$0xff]  ;;  %v732_v15 = vld [vmem:[#allocation12 + $0xb0] sm:$0xff]  ;;  %v731_v16 = vld [vmem:[#allocation12 + $0xa8] sm:$0xff]  ;;  %p2480_p3 = por %p2479_p5, %p2478_p10 }
  0xce   : > { %658 = vmatpush1.msra.mxu1 %v607_v50  ;;  %549 = vmatpush1.msra.mxu0 %v498_v53  ;;  %v730_v17 = vld [vmem:[#allocation12 + $0xa0] sm:$0xff]  ;;  %v729_v18 = vld [vmem:[#allocation12 + $0x98] sm:$0xff]  ;;  %v728_v19 = vld [vmem:[#allocation12 + $0x90] sm:$0xff] }
  0xcf   : > { %659 = vmatprep.subr.mxu1 %v606_v52  ;;  %550 = vmatprep.subr.mxu0 %v497_v55  ;;  %v727_v21 = vld [vmem:[#allocation12 + $0x88] sm:$0xff]  ;;  %v726_v23 = vld [vmem:[#allocation12 + $0x80] sm:$0xff]  ;;  %v725_v26 = vld [vmem:[#allocation12 + $0x78] sm:$0xff]  ;;  %p2481_p6 = pnand %p2480_p3, %p2474_p12 }
  0xd0   : > { %660 = vmatpush1.msra.mxu1 %v605_v54  ;;  %551 = vmatpush1.msra.mxu0 %v496_v57  ;;  %v724_v29 = vld [vmem:[#allocation12 + $0x70] sm:$0xff]  ;;  %v723_v30 = vld [vmem:[#allocation12 + $0x68] sm:$0xff]  ;;  %v722_v31 = vld [vmem:[#allocation12 + $0x60] sm:$0xff] }
  0xd1   : > { %661 = vmatprep.subr.mxu1 %v604_v56  ;;  %552 = vmatprep.subr.mxu0 %v495_v59  ;;  %v721_v32 = vld [vmem:[#allocation12 + $0x58] sm:$0xff]  ;;  %v720_v34 = vld [vmem:[#allocation12 + $0x50] sm:$0xff]  ;;  %v719_v36 = vld [vmem:[#allocation12 + $0x48] sm:$0xff] }
  0xd2   : > { %662 = vmatpush1.msra.mxu1 %v603_v58  ;;  %553 = vmatpush1.msra.mxu0 %v494_v61  ;;  %v718_v37 = vld [vmem:[#allocation12 + $0x40] sm:$0xff]  ;;  %v717_v38 = vld [vmem:[#allocation12 + $0x38] sm:$0xff]  ;;  %v716_v39 = vld [vmem:[#allocation12 + $0x30] sm:$0xff] }
  0xd3   : > { %663 = vmatprep.subr.mxu1 %v602_v60  ;;  %554 = vmatprep.subr.mxu0 %v493_v63  ;;  %v715_v40 = vld [vmem:[#allocation12 + $0x28] sm:$0xff]  ;;  %v714_v41 = vld [vmem:[#allocation12 + $0x20] sm:$0xff]  ;;  %v713_v42 = vld [vmem:[#allocation12 + $0x18] sm:$0xff] }
  0xd4   : > { %664 = vmatpush1.msra.mxu1 %v601_v62  ;;  %555 = vmatpush1.msra.mxu0 %v492_v2  ;;  %v712_v43 = vld [vmem:[#allocation12 + $0x10] sm:$0xff]  ;;  %v711_v44 = vld [vmem:[#allocation12 + $0x8] sm:$0xff]  ;;  %v710_v45 = vld [vmem:[#allocation12] sm:$0xff] }
  0xd5   : > { %698 = vmatmul.mubr.f32.vlgmr.msra.gmra.mxu1 %v488_v1  ;;  %589 = vmatmul.mubr.f32.vlgmr.msra.gmra.mxu0 %v2886_v3  ;;  %v490_v46 = vld [vmem:[%s425_s16] sm:$0xff]  ;;  %v491_v47 = vld [vmem:[%s425_s16 + $0x8] sm:$0xff] }
  0xd6   : > { %703 = vmatprep.mubr.f32.mxu1 %v2560_v0  ;;  %594 = vmatprep.mubr.f32.mxu0 %v2560_v0 }
  0xd7   : > { %742 = vmatprep.subr.mxu0 %v741_v6 }
  0xd8   : > { %743 = vmatpush1.msra.mxu0 %v740_v7 }
  0xd9   : > { %704 = vmatmul.mubr.f32.gmra.mxu1 %v489_v4  ;;  %595 = vmatmul.mubr.f32.gmra.mxu0 %v2895_v5 }
  0xda   : > { %806 = vmatprep.mubr.f32.mxu0 %v2560_v0  ;;  %744 = vmatprep.subr.mxu0 %v739_v8 }
  0xdb   : > { %745 = vmatpush1.msra.mxu0 %v738_v9 }
  0xdc   : > { %746 = vmatprep.subr.mxu0 %v737_v10 }
  0xdd   : > { %747 = vmatpush1.msra.mxu0 %v736_v11 }
  0xde   : > { %748 = vmatprep.subr.mxu0 %v735_v12 }
  0xdf   : > { %749 = vmatpush1.msra.mxu0 %v734_v13 }
  0xe0   : > { %750 = vmatprep.subr.mxu0 %v733_v14 }
  0xe1   : > { %751 = vmatpush1.msra.mxu0 %v732_v15 }
  0xe2   : > { %752 = vmatprep.subr.mxu0 %v731_v16 }
  0xe3   : > { %753 = vmatpush1.msra.mxu0 %v730_v17 }
  0xe4   : > { %754 = vmatprep.subr.mxu0 %v729_v18 }
  0xe5   : > { %755 = vmatpush1.msra.mxu0 %v728_v19 }
  0xe6   : > { %756 = vmatprep.subr.mxu0 %v727_v21 }
  0xe7   : > { %757 = vmatpush1.msra.mxu0 %v726_v23 }
  0xe8   : > { %758 = vmatprep.subr.mxu0 %v725_v26 }
  0xe9   : > { %759 = vmatpush1.msra.mxu0 %v724_v29 }
  0xea   : > { %760 = vmatprep.subr.mxu0 %v723_v30 }
  0xeb   : > { %761 = vmatpush1.msra.mxu0 %v722_v31 }
  0xec   : > { %762 = vmatprep.subr.mxu0 %v721_v32 }
  0xed   : > { %763 = vmatpush1.msra.mxu0 %v720_v34 }
  0xee   : > { %764 = vmatprep.subr.mxu0 %v719_v36 }
  0xef   : > { %765 = vmatpush1.msra.mxu0 %v718_v37 }
  0xf0   : > { %766 = vmatprep.subr.mxu0 %v717_v38 }
  0xf1   : > { %767 = vmatpush1.msra.mxu0 %v716_v39 }
  0xf2   : > { %768 = vmatprep.subr.mxu0 %v715_v40 }
  0xf3   : > { %769 = vmatpush1.msra.mxu0 %v714_v41 }
  0xf4   : > { %770 = vmatprep.subr.mxu0 %v713_v42 }
  0xf5   : > { %771 = vmatpush1.msra.mxu0 %v712_v43 }
  0xf6   : > { %772 = vmatprep.subr.mxu0 %v711_v44 }
  0xf7   : > { %773 = vmatpush1.msra.mxu0 %v710_v45 }
  0xf8   : > { %807 = vmatmul.mubr.f32.vlgmr.msra.gmra.mxu0 %v490_v46 }
  0xf9   : > { %812 = vmatprep.mubr.f32.mxu0 %v2560_v0 }
  0xfc   : > { %813 = vmatmul.mubr.f32.gmra.mxu0 %v491_v47 }
 0x195   : > { %v699_v20 = vpop.f32.mrf.mxu1  ;;  %v590_v22 = vpop.f32.mrf.mxu0 }
 0x196   : > { %1021 = vrot.lane.b32.xlu1 %v699_v20, %s2561_s15  ;;  %v819_v25 = vmul.f32 0.125, %v590_v22 }
 0x197   : > { %v2900_v24 = vpop.f32.mrf.mxu1  ;;  %v2904_v28 = vpop.f32.mrf.mxu0 }
 0x198   : > { %2090 = vmatprep.mubr.msk.f32.mxu1 %vm823_vm0, %v819_v25  ;;  %v820_v41 = vmul.f32 0.125, %v2904_v28 }
 0x199   : > { %v2902_v27 = vpop.f32.mrf.mxu1  ;;  %v596_v33 = vpop.f32.mrf.mxu0 }
 0x19a   : > { %2086 = vmatprep.subr.msk.mxu1 %vm823_vm0, %v2902_v27  ;;  %1017 = vrot.lane.b32.xlu1 %v819_v25, %s2561_s15  ;;  %v2913_v35 = vmul.f32 0.125, %v596_v33 }
 0x19b   : > { %2087 = vmatpush3.xpose.msk.msra.mxu1 %vm823_vm0, %v2902_v27  ;;  %v2923_v48 = vpop.f32.mrf.mxu1  ;;  %v2927_v53 = vpop.f32.mrf.mxu0 }
 0x19c   : > { %2088 = vmatprep.subr.msk.mxu1 %vm823_vm0, %v699_v20  ;;  %v822_v43 = vmul.f32 0.125, %v2927_v53 }
 0x19f   : > { %2089 = vmatpush3.xpose.msk.msra.mxu1 %vm823_vm0, %v699_v20 }
 0x1a2   : > { %2091 = vmatmul.mubr.msk.f32.vlgmr.msra.gmra.mxu1 %vm823_vm0, %v2913_v35 }
 0x1b8   : > { %v808_v54 = vpop.f32.mrf.mxu0 }
 0x1ba   : > { %v2929_v55 = vpop.f32.mrf.mxu0 }
 0x1bc   : > { %v2931_v0 = vpop.f32.mrf.mxu0 }
 0x1bd   : > { %2093 = vmatprep.subr.mxu1 %v2931_v0 }
 0x1be   : > { %2094 = vmatpush3.msra.mxu1 %v2931_v0  ;;  %v2968_v42 = vpop.f32.mrf.mxu0 }
 0x1bf   : > { %2095 = vmatprep.subr.mxu1 %v808_v54 }
 0x1c0   : > { %2096 = vmatpush3.msra.mxu1 %v808_v54 }
 0x208   : > { %v1022_v6 = vpop.permute.xlu1 %1021 }
 0x20c   : > { %v1018_v7 = vpop.permute.xlu1 %1017 }
 0x262   : > { %v2092_v49 = vpop.f32.mrf.mxu1 }
 0x263   : > { %v915_v52 = vsel %vm911_vm1, %v2092_v49, -inf }
 0x264   : > { %v902_v50 = vpop.f32.mrf.mxu1 }
 0x265   : > { %v912_v51 = vsel %vm911_vm1, %v902_v50, -inf }
 0x266   : > { %913 = vmax.xlane.f32.xlu0 %v912_v51 }
 0x26a   : > { %916 = vmax.xlane.f32.xlu0 %v915_v52 }
 0x280   : > { %1023 = vrot.lane.b32.xlu0 %v2902_v27, %s2561_s15 }
 0x2ef   : > { %v914_v56 = vpop.xlane.xlu0 %913 }
 0x2f0   : > { %v918_v57 = vsub.f32 %v902_v50, %v914_v56 }
 0x2f2   : > { %v920_v60 = vmul.f32 1.442695, %v918_v57 }
 0x2f3   : > { %v917_v58 = vpop.xlane.xlu0 %916 }
 0x2f4   : > { %v919_v59 = vsub.f32 %v2092_v49, %v917_v58 }
 0x2f6   : > { %v922_v61 = vmul.f32 1.442695, %v919_v59 }
 0x2f7   : > { %v1024_v62 = vpop.permute.xlu0 %1023 }
 0x2f8   : > { %2247 = vpow2.f32 %v922_v61  ;;  %2100 = vmatprep.subr.msk.mxu1 %vm823_vm0, %v1024_v62 }
 0x2f9   : > { %2249 = vpow2.f32 %v920_v60 }
 0x305   : > { %v2248_v63 = vpop.eup %2247 }
 0x306   : > { %v927_v1 = vsel %vm911_vm1, %v2248_v63, 0.0  ;;  %v2250_v2 = vpop.eup %2249 }
 0x307   : > { %928 = vadd.xlane.f32.xlu1 %v927_v1  ;;  %v924_v4 = vsel %vm911_vm1, %v2250_v2, 0.0 }
 0x30b   : > { %925 = vadd.xlane.f32.xlu1 %v924_v4 }
 0x31c   : > { %1019 = vrot.lane.b32.xlu1 %v2913_v35, %s2561_s15 }
 0x390   : > { %v929_v8 = vpop.xlane.xlu1 %928 }
 0x391   : > { %2251 = vrcp.f32 %v929_v8 }
 0x394   : > { %v926_v9 = vpop.xlane.xlu1 %925 }
 0x395   : > { %2253 = vrcp.f32 %v926_v9 }
 0x398   : > { %v1020_v14 = vpop.permute.xlu1 %1019 }
 0x39e   : > { %v2252_v10 = vpop.eup %2251 }
 0x39f   : > { %v933_v13 = vmul.f32 %v2252_v10, %v2248_v63 }
 0x3a2   : > { %v2254_v11 = vpop.eup %2253 }
 0x3a3   : > { %v932_v12 = vmul.f32 %v2254_v11, %v2250_v2 }
 0x3a5   : > { %2097 = vmatprep.mubr.msk.f32.mxu1 %vm911_vm1, %v932_v12 }
 0x3a6   : > { %2098 = vmatmul.mubr.msk.f32.vlgmr.msra.gmra.mxu1 %vm911_vm1, %v933_v13 }
 0x3a7   : > { %2101 = vmatpush3.xpose.msk.msra.mxu1 %vm823_vm0, %v1024_v62  ;;  %2104 = vmatprep.mubr.msk.f32.mxu1 %vm823_vm0, %v1018_v7 }
 0x3a8   : > { %2102 = vmatprep.subr.msk.mxu1 %vm823_vm0, %v1022_v6 }
 0x3ab   : > { %2103 = vmatpush3.xpose.msk.msra.mxu1 %vm823_vm0, %v1022_v6 }
 0x3ae   : > { %2105 = vmatmul.mubr.msk.f32.vlgmr.msra.gmra.mxu1 %vm823_vm0, %v1020_v14 }
 0x466   : > { %v2099_v15 = vpop.f32.mrf.mxu1 }
 0x467   : > { %1016 = vst.msk [vmem:[#allocation2 + $0x10] sm:$0xff] %vm823_vm0, %v2099_v15 }
 0x468   : > { %v1006_v16 = vpop.f32.mrf.mxu1 }
 0x469   : > { %1015 = vst.msk [vmem:[#allocation2] sm:$0xff] %vm823_vm0, %v1006_v16 }
 0x46e   : > { %v2106_v17 = vpop.f32.mrf.mxu1 }
 0x46f   : > { %v1111_v18 = vsel %vm911_vm1, %v2106_v17, -inf }
 0x470   : > { %1112 = vmax.xlane.f32.xlu1 %v1111_v18  ;;  %v1099_v19 = vpop.f32.mrf.mxu1 }
 0x471   : > { %v1108_v20 = vsel %vm911_vm1, %v1099_v19, -inf }
 0x472   : > { %1109 = vmax.xlane.f32.xlu0 %v1108_v20 }
 0x481   : > { %1132 = vrot.lane.b32.xlu1 %v808_v54, %s2561_s15 }
 0x4f9   : > { %v1113_v21 = vpop.xlane.xlu1 %1112 }
 0x4fa   : > { %v1115_v22 = vsub.f32 %v2106_v17, %v1113_v21 }
 0x4fb   : > { %v1110_v23 = vpop.xlane.xlu0 %1109 }
 0x4fc   : > { %v1118_v25 = vmul.f32 1.442695, %v1115_v22  ;;  %v1114_v26 = vsub.f32 %v1099_v19, %v1110_v23 }
 0x4fd   : > { %v1133_v36 = vpop.permute.xlu1 %1132 }
 0x4fe   : > { %2255 = vpow2.f32 %v1118_v25  ;;  %v1116_v27 = vmul.f32 1.442695, %v1114_v26 }
 0x500   : > { %2257 = vpow2.f32 %v1116_v27 }
 0x50b   : > { %v2256_v29 = vpop.eup %2255 }
 0x50c   : > { %v1123_v30 = vsel %vm911_vm1, %v2256_v29, 0.0 }
 0x50d   : > { %v2258_v31 = vpop.eup %2257  ;;  %1124 = vadd.xlane.f32.xlu0 %v1123_v30 }
 0x50e   : > { %v1120_v32 = vsel %vm911_vm1, %v2258_v31, 0.0 }
 0x511   : > { %1121 = vadd.xlane.f32.xlu0 %v1120_v32  ;;  %v1669_v32 = vld [vmem:[#allocation14 + $0xf8] sm:$0xff] }
 0x512   : > { %2048 = vmatprep.subr.mxu0 %v1669_v32 }
 0x527   : > { %1134 = vrot.lane.b32.xlu0 %v2931_v0, %s2561_s15 }
 0x596   : > { %v1125_v33 = vpop.xlane.xlu0 %1124 }
 0x597   : > { %2259 = vrcp.f32 %v1125_v33  ;;  %v1653_v33 = vld [vmem:[#allocation14 + $0x78] sm:$0xff] }
 0x598   : > { %2049 = vmatpush3.msra.mxu0 %v1653_v33  ;;  %v2005_v33 = vld [vmem:[%s3083_s7] ss:$0 sm:$0xff] }
 0x59a   : > { %v1122_v34 = vpop.xlane.xlu0 %1121 }
 0x59b   : > { %2261 = vrcp.f32 %v1122_v34  ;;  %v1668_v34 = vld [vmem:[#allocation14 + $0xf0] sm:$0xff] }
 0x59c   : > { %2050 = vmatprep.subr.mxu0 %v1668_v34 }
 0x59e   : > { %v1135_v35 = vpop.permute.xlu0 %1134 }
 0x59f   : > { %2107 = vmatprep.subr.mxu1 %v1135_v35 }
 0x5a0   : > { %2108 = vmatpush3.msra.mxu1 %v1135_v35  ;;  %v1652_v35 = vld [vmem:[#allocation14 + $0x70] sm:$0xff] }
 0x5a1   : > { %2109 = vmatprep.subr.mxu1 %v1133_v36  ;;  %2051 = vmatpush3.msra.mxu0 %v1652_v35  ;;  %v2006_v35 = vld [vmem:[%s3084_s8] ss:$0 sm:$0xff] }
 0x5a2   : > { %2110 = vmatpush3.msra.mxu1 %v1133_v36  ;;  %v1667_v36 = vld [vmem:[#allocation14 + $0xe8] sm:$0xff] }
 0x5a3   : > { %2114 = vmatprep.subr.msk.mxu1 %vm823_vm0, %v2923_v48  ;;  %2052 = vmatprep.subr.mxu0 %v1667_v36 }
 0x5a4   : > { %v2260_v37 = vpop.eup %2259 }
 0x5a5   : > { %v1129_v40 = vmul.f32 %v2260_v37, %v2256_v29  ;;  %v1651_v37 = vld [vmem:[#allocation14 + $0x68] sm:$0xff] }
 0x5a6   : > { %2053 = vmatpush3.msra.mxu0 %v1651_v37 }
 0x5a8   : > { %v2262_v38 = vpop.eup %2261 }
 0x5a9   : > { %v1128_v39 = vmul.f32 %v2262_v38, %v2258_v31  ;;  %v1666_v38 = vld [vmem:[#allocation14 + $0xe0] sm:$0xff] }
 0x5aa   : > { %2054 = vmatprep.subr.mxu0 %v1666_v38 }
 0x5ab   : > { %2111 = vmatprep.mubr.msk.f32.mxu1 %vm911_vm1, %v1128_v39  ;;  %v1650_v39 = vld [vmem:[#allocation14 + $0x60] sm:$0xff] }
 0x5ac   : > { %2112 = vmatmul.mubr.msk.f32.vlgmr.msra.gmra.mxu1 %vm911_vm1, %v1129_v40  ;;  %v1665_v40 = vld [vmem:[#allocation14 + $0xd8] sm:$0xff]  ;;  %2055 = vmatpush3.msra.mxu0 %v1650_v39 }
 0x5ad   : > { %2115 = vmatpush3.xpose.msk.msra.mxu1 %vm823_vm0, %v2923_v48  ;;  %2118 = vmatprep.mubr.msk.f32.mxu1 %vm823_vm0, %v820_v41 }
 0x5ae   : > { %2116 = vmatprep.subr.msk.mxu1 %vm823_vm0, %v2900_v24  ;;  %2056 = vmatprep.subr.mxu0 %v1665_v40 }
 0x5b1   : > { %2117 = vmatpush3.xpose.msk.msra.mxu1 %vm823_vm0, %v2900_v24 }
 0x5b2   : > { %2121 = vmatprep.subr.mxu1 %v2968_v42 }
 0x5b4   : > { %2119 = vmatmul.mubr.msk.f32.vlgmr.msra.gmra.mxu1 %vm823_vm0, %v822_v43 }
 0x5b5   : > { %2122 = vmatpush3.msra.mxu1 %v2968_v42 }
 0x5b6   : > { %2123 = vmatprep.subr.mxu1 %v2929_v55 }
 0x5b7   : > { %2124 = vmatpush3.msra.mxu1 %v2929_v55 }
 0x66c   : > { %v2978_v28 = vpop.f32.mrf.mxu1 }
 0x66e   : > { %v2980_v44 = vpop.f32.mrf.mxu1 }
 0x674   : > { %v2120_v45 = vpop.f32.mrf.mxu1 }
 0x675   : > { %v1320_v46 = vsel %vm911_vm1, %v2120_v45, -inf }
 0x676   : > { %1321 = vmax.xlane.f32.xlu0 %v1320_v46  ;;  %v1308_v47 = vpop.f32.mrf.mxu1  ;;  %v1647_v46 = vld [vmem:[#allocation14 + $0x48] sm:$0xff] }
 0x677   : > { %v1317_v49 = vsel %vm911_vm1, %v1308_v47, -inf }
 0x678   : > { %1318 = vmax.xlane.f32.xlu1 %v1317_v49  ;;  %v1646_v49 = vld [vmem:[#allocation14 + $0x40] sm:$0xff] }
 0x6ff   : > { %v1322_v50 = vpop.xlane.xlu0 %1321 }
 0x700   : > { %v1324_v51 = vsub.f32 %v2120_v45, %v1322_v50  ;;  %v1663_v45 = vld [vmem:[#allocation14 + $0xc8] sm:$0xff]  ;;  %v1661_v50 = vld [vmem:[#allocation14 + $0xb8] sm:$0xff] }
 0x701   : > { %v1319_v52 = vpop.xlane.xlu1 %1318 }
 0x702   : > { %v1327_v53 = vmul.f32 1.442695, %v1324_v51  ;;  %v1323_v54 = vsub.f32 %v1308_v47, %v1319_v52  ;;  %v1662_v47 = vld [vmem:[#allocation14 + $0xc0] sm:$0xff]  ;;  %v1645_v51 = vld [vmem:[#allocation14 + $0x38] sm:$0xff]  ;;  %v1660_v52 = vld [vmem:[#allocation14 + $0xb0] sm:$0xff] }
 0x704   : > { %2263 = vpow2.f32 %v1327_v53  ;;  %v1325_v0 = vmul.f32 1.442695, %v1323_v54  ;;  %v1644_v53 = vld [vmem:[#allocation14 + $0x30] sm:$0xff]  ;;  %v1659_v54 = vld [vmem:[#allocation14 + $0xa8] sm:$0xff] }
 0x706   : > { %2265 = vpow2.f32 %v1325_v0  ;;  %v1643_v0 = vld [vmem:[#allocation14 + $0x28] sm:$0xff] }
 0x711   : > { %v2264_v56 = vpop.eup %2263 }
 0x712   : > { %v1332_v57 = vsel %vm911_vm1, %v2264_v56, 0.0 }
 0x713   : > { %v2266_v58 = vpop.eup %2265  ;;  %1333 = vadd.xlane.f32.xlu1 %v1332_v57  ;;  %v1642_v57 = vld [vmem:[#allocation14 + $0x20] sm:$0xff] }
 0x714   : > { %v1329_v59 = vsel %vm911_vm1, %v2266_v58, 0.0 }
 0x715   : > { %1330 = vadd.xlane.f32.xlu0 %v1329_v59  ;;  %v1641_v59 = vld [vmem:[#allocation14 + $0x18] sm:$0xff] }
 0x724   : > { %1426 = vrot.lane.b32.xlu1 %v2900_v24, %s2561_s15 }
 0x728   : > { %1422 = vrot.lane.b32.xlu1 %v820_v41, %s2561_s15  ;;  %v1649_v41 = vld [vmem:[#allocation14 + $0x58] sm:$0xff] }
 0x729   : > { %2057 = vmatpush3.msra.mxu0 %v1649_v41 }
 0x72b   : > { %1428 = vrot.lane.b32.xlu0 %v2923_v48, %s2561_s15 }
 0x72c   : > { %1424 = vrot.lane.b32.xlu1 %v822_v43, %s2561_s15  ;;  %v1648_v43 = vld [vmem:[#allocation14 + $0x50] sm:$0xff] }
 0x79c   : > { %v1334_v60 = vpop.xlane.xlu1 %1333 }
 0x79d   : > { %2267 = vrcp.f32 %v1334_v60  ;;  %v1656_v60 = vld [vmem:[#allocation14 + $0x90] sm:$0xff] }
 0x79e   : > { %v1331_v61 = vpop.xlane.xlu0 %1330 }
 0x79f   : > { %2269 = vrcp.f32 %v1331_v61  ;;  %v1640_v61 = vld [vmem:[#allocation14 + $0x10] sm:$0xff] }
 0x7a0   : > { %v1427_v63 = vpop.permute.xlu1 %1426 }
 0x7a2   : > { %v1429_v62 = vpop.permute.xlu0 %1428 }
 0x7a3   : > { %2128 = vmatprep.subr.msk.mxu1 %vm823_vm0, %v1429_v62 }
 0x7a4   : > { %v1423_v24 = vpop.permute.xlu1 %1422 }
 0x7a8   : > { %v1425_v48 = vpop.permute.xlu1 %1424 }
 0x7aa   : > { %v2268_v1 = vpop.eup %2267 }
 0x7ab   : > { %v1338_v6 = vmul.f32 %v2268_v1, %v2264_v56  ;;  %v1658_v56 = vld [vmem:[#allocation14 + $0xa0] sm:$0xff] }
 0x7ac   : > { %v2270_v2 = vpop.eup %2269  ;;  %v1654_v1 = vld [vmem:[#allocation14 + $0x80] sm:$0xff] }
 0x7ad   : > { %v1337_v4 = vmul.f32 %v2270_v2, %v2266_v58  ;;  %v1657_v58 = vld [vmem:[#allocation14 + $0x98] sm:$0xff]  ;;  %v1638_v2 = vld [vmem:[#allocation14] sm:$0xff] }
 0x7af   : > { %2125 = vmatprep.mubr.msk.f32.mxu1 %vm911_vm1, %v1337_v4 }
 0x7b0   : > { %2126 = vmatmul.mubr.msk.f32.vlgmr.msra.gmra.mxu1 %vm911_vm1, %v1338_v6 }
 0x7b1   : > { %2129 = vmatpush3.xpose.msk.msra.mxu1 %vm823_vm0, %v1429_v62  ;;  %2132 = vmatprep.mubr.msk.f32.mxu1 %vm823_vm0, %v1423_v24  ;;  %v1655_v62 = vld [vmem:[#allocation14 + $0x88] sm:$0xff] }
 0x7b2   : > { %2130 = vmatprep.subr.msk.mxu1 %vm823_vm0, %v1427_v63 }
 0x7b5   : > { %2131 = vmatpush3.xpose.msk.msra.mxu1 %vm823_vm0, %v1427_v63  ;;  %v1639_v63 = vld [vmem:[#allocation14 + $0x8] sm:$0xff] }
 0x7b8   : > { %2133 = vmatmul.mubr.msk.f32.vlgmr.msra.gmra.mxu1 %vm823_vm0, %v1425_v48 }
 0x870   : > { %v2127_v7 = vpop.f32.mrf.mxu1 }
 0x871   : > { %1421 = vst.msk [vmem:[#allocation2 + $0x18] sm:$0xff] %vm823_vm0, %v2127_v7 }
 0x872   : > { %v1411_v8 = vpop.f32.mrf.mxu1 }
 0x873   : > { %1420 = vst.msk [vmem:[#allocation2 + $0x8] sm:$0xff] %vm823_vm0, %v1411_v8 }
 0x878   : > { %v2134_v9 = vpop.f32.mrf.mxu1 }
 0x879   : > { %v1516_v10 = vsel %vm911_vm1, %v2134_v9, -inf }
 0x87a   : > { %1517 = vmax.xlane.f32.xlu1 %v1516_v10  ;;  %v1504_v11 = vpop.f32.mrf.mxu1 }
 0x87b   : > { %v1513_v12 = vsel %vm911_vm1, %v1504_v11, -inf }
 0x87c   : > { %1514 = vmax.xlane.f32.xlu0 %v1513_v12 }
 0x88b   : > { %1537 = vrot.lane.b32.xlu1 %v2929_v55, %s2561_s15 }
 0x903   : > { %v1518_v13 = vpop.xlane.xlu1 %1517 }
 0x904   : > { %v1520_v14 = vsub.f32 %v2134_v9, %v1518_v13 }
 0x905   : > { %v1515_v15 = vpop.xlane.xlu0 %1514 }
 0x906   : > { %v1523_v16 = vmul.f32 1.442695, %v1520_v14  ;;  %v1519_v17 = vsub.f32 %v1504_v11, %v1515_v15 }
 0x907   : > { %v1538_v26 = vpop.permute.xlu1 %1537 }
 0x908   : > { %2271 = vpow2.f32 %v1523_v16  ;;  %v1521_v18 = vmul.f32 1.442695, %v1519_v17 }
 0x90a   : > { %2273 = vpow2.f32 %v1521_v18 }
 0x915   : > { %v2272_v19 = vpop.eup %2271 }
 0x916   : > { %v1528_v20 = vsel %vm911_vm1, %v2272_v19, 0.0 }
 0x917   : > { %v2274_v21 = vpop.eup %2273  ;;  %1529 = vadd.xlane.f32.xlu0 %v1528_v20 }
 0x918   : > { %v1525_v22 = vsel %vm911_vm1, %v2274_v21, 0.0 }
 0x91b   : > { %1526 = vadd.xlane.f32.xlu0 %v1525_v22 }
 0x931   : > { %1539 = vrot.lane.b32.xlu0 %v2968_v42, %s2561_s15  ;;  %v1664_v42 = vld [vmem:[#allocation14 + $0xd0] sm:$0xff] }
 0x932   : > { %2058 = vmatprep.subr.mxu0 %v1664_v42 }
 0x933   : > { %2059 = vmatpush3.msra.mxu0 %v1648_v43 }
 0x934   : > { %2060 = vmatprep.subr.mxu0 %v1663_v45 }
 0x935   : > { %2061 = vmatpush3.msra.mxu0 %v1647_v46 }
 0x936   : > { %2062 = vmatprep.subr.mxu0 %v1662_v47 }
 0x937   : > { %2063 = vmatpush3.msra.mxu0 %v1646_v49 }
 0x938   : > { %2064 = vmatprep.subr.mxu0 %v1661_v50 }
 0x939   : > { %2065 = vmatpush3.msra.mxu0 %v1645_v51 }
 0x93a   : > { %2066 = vmatprep.subr.mxu0 %v1660_v52 }
 0x93b   : > { %2067 = vmatpush3.msra.mxu0 %v1644_v53 }
 0x93c   : > { %2068 = vmatprep.subr.mxu0 %v1659_v54 }
 0x93d   : > { %2069 = vmatpush3.msra.mxu0 %v1643_v0 }
 0x93e   : > { %2070 = vmatprep.subr.mxu0 %v1658_v56 }
 0x93f   : > { %2071 = vmatpush3.msra.mxu0 %v1642_v57 }
 0x940   : > { %2072 = vmatprep.subr.mxu0 %v1657_v58 }
 0x941   : > { %2073 = vmatpush3.msra.mxu0 %v1641_v59 }
 0x942   : > { %2074 = vmatprep.subr.mxu0 %v1656_v60 }
 0x943   : > { %2075 = vmatpush3.msra.mxu0 %v1640_v61 }
 0x944   : > { %2076 = vmatprep.subr.mxu0 %v1655_v62 }
 0x945   : > { %2077 = vmatpush3.msra.mxu0 %v1639_v63 }
 0x946   : > { %2078 = vmatprep.subr.mxu0 %v1654_v1 }
 0x947   : > { %2079 = vmatpush3.msra.mxu0 %v1638_v2 }
 0x9a0   : > { %v1530_v55 = vpop.xlane.xlu0 %1529 }
 0x9a1   : > { %2275 = vrcp.f32 %v1530_v55 }
 0x9a4   : > { %v1527_v23 = vpop.xlane.xlu0 %1526 }
 0x9a5   : > { %2277 = vrcp.f32 %v1527_v23 }
 0x9a8   : > { %v1540_v25 = vpop.permute.xlu0 %1539 }
 0x9a9   : > { %2135 = vmatprep.subr.mxu1 %v1540_v25 }
 0x9aa   : > { %2136 = vmatpush3.msra.mxu1 %v1540_v25 }
 0x9ab   : > { %2137 = vmatprep.subr.mxu1 %v1538_v26 }
 0x9ac   : > { %2138 = vmatpush3.msra.mxu1 %v1538_v26 }
 0x9ae   : > { %v2276_v27 = vpop.eup %2275 }
 0x9af   : > { %v1534_v31 = vmul.f32 %v2276_v27, %v2272_v19 }
 0x9b2   : > { %v2278_v29 = vpop.eup %2277 }
 0x9b3   : > { %v1533_v30 = vmul.f32 %v2278_v29, %v2274_v21 }
 0x9b5   : > { %2139 = vmatprep.mubr.msk.f32.mxu1 %vm911_vm1, %v1533_v30 }
 0x9b6   : > { %2140 = vmatmul.mubr.msk.f32.vlgmr.msra.gmra.mxu1 %vm911_vm1, %v1534_v31 }
 0xa76   : > { %v2141_v4 = vpop.f32.mrf.mxu1 }
 0xa77   : > { %1628 = vrot.lane.b32.xlu0 %v2141_v4, %s2561_s15 }
 0xa78   : > { %v1615_v6 = vpop.f32.mrf.mxu1 }
 0xa79   : > { %1626 = vrot.lane.b32.xlu1 %v1615_v6, %s2561_s15 }
 0xa7d   : > { %1221 = vrot.lane.b32.xlu1 %v2980_v44, %s2561_s15 }
 0xa81   : > { %1223 = vrot.lane.b32.xlu1 %v2978_v28, %s2561_s15 }
 0xae9   : > { %v1629_v24 = vpop.permute.xlu0 %1628 }
 0xaea   : > { %1633 = vst.msk [vmem:[#allocation2 + $0x18] sm:$0xff] %vm1227_vm2, %v1629_v24 }
 0xaeb   : > { %v1627_v48 = vpop.permute.xlu1 %1626 }
 0xaec   : > { %1632 = vst.msk [vmem:[#allocation2 + $0x8] sm:$0xff] %vm1227_vm2, %v1627_v48 }
 0xaef   : > { %v1222_v7 = vpop.permute.xlu1 %1221 }
 0xaf0   : > { %1228 = vst.msk [vmem:[#allocation2] sm:$0xff] %vm1227_vm2, %v1222_v7 }
 0xaf1   : > { %v1637_v11 = vld [vmem:[#allocation2 + $0x18] sm:$0xff] }
 0xaf3   : > { %v1224_v8 = vpop.permute.xlu1 %1223  ;;  %v1635_v9 = vld [vmem:[#allocation2 + $0x8] sm:$0xff] }
 0xaf4   : > { %1229 = vst.msk [vmem:[#allocation2 + $0x10] sm:$0xff] %vm1227_vm2, %v1224_v8  ;;  %1734 = vmatprep.mubr.f32.mxu0 %v1635_v9 }
 0xaf7   : > { %v1634_v10 = vld [vmem:[#allocation2] sm:$0xff] }
 0xaf8   : > { %1735 = vmatmul.mubr.f32.vlgmr.msra.gmra.mxu0 %v1634_v10 }
 0xaf9   : > { %1739 = vmatprep.mubr.f32.mxu0 %v1637_v11 }
 0xafb   : > { %v1636_v12 = vld [vmem:[#allocation2 + $0x10] sm:$0xff] }
 0xafc   : > { %1740 = vmatmul.mubr.f32.gmra.mxu0 %v1636_v12 }
 0xbb8   : > { %v2080_v44 = vpop.f32.mrf.mxu0 }
 0xbba   : > { %v2081_v13 = vpop.f32.mrf.mxu0 }
 0xbbb   : > { %v2082_v28 = vadd.f32 %v2081_v13, %v2080_v44 }
 0xbbc   : > { %v2083_v14 = vpop.f32.mrf.mxu0 }
 0xbbd   : > { %v1737_v15 = vadd.f32 %v2082_v28, %v2886_v3 }
 0xbbe   : > { %v2084_v16 = vpop.f32.mrf.mxu0 }
 0xbbf   : > { %v2085_v17 = vadd.f32 %v2084_v16, %v2083_v14  ;;  %1745 = vadd.xlane.f32.xlu0 %v1737_v15 }
 0xbc1   : > { %v1742_v18 = vadd.f32 %v2085_v17, %v2895_v5 }
 0xbc3   : > { %1747 = vadd.xlane.f32.xlu1 %v1742_v18 }
 0xc48   : > { %v1746_v19 = vpop.xlane.xlu0 %1745 }
 0xc49   : > { %v1750_v20 = vmul.f32 0.0078125, %v1746_v19 }
 0xc4b   : > { %v1752_v21 = vsub.f32 %v1737_v15, %v1750_v20 }
 0xc4c   : > { %v1748_v22 = vpop.xlane.xlu1 %1747 }
 0xc4d   : > { %v1751_v55 = vmul.f32 0.0078125, %v1748_v22  ;;  %v1754_v23 = vmul.f32 %v1752_v21, %v1752_v21 }
 0xc4f   : > { %v1753_v25 = vsub.f32 %v1742_v18, %v1751_v55  ;;  %1756 = vadd.xlane.f32.xlu0 %v1754_v23 }
 0xc51   : > { %v1755_v26 = vmul.f32 %v1753_v25, %v1753_v25 }
 0xc53   : > { %1758 = vadd.xlane.f32.xlu0 %v1755_v26 }
 0xcd8   : > { %v1757_v27 = vpop.xlane.xlu0 %1756 }
 0xcd9   : > { %v1760_v29 = vmul.f32 0.0078125, %v1757_v27 }
 0xcdb   : > { %v1762_v3 = vadd.f32 1e-05, %v1760_v29 }
 0xcdc   : > { %v1759_v30 = vpop.xlane.xlu0 %1758 }
 0xcdd   : > { %2279 = vrsqrt.f32 %v1762_v3  ;;  %v1761_v31 = vmul.f32 0.0078125, %v1759_v30 }
 0xcdf   : > { %v1763_v5 = vadd.f32 1e-05, %v1761_v31 }
 0xce1   : > { %2281 = vrsqrt.f32 %v1763_v5 }
 0xcea   : > { %v2280_v32 = vpop.eup %2279 }
 0xceb   : > { %v1766_v34 = vmul.f32 %v2280_v32, %v1752_v21 }
 0xced   : > { %v1776_v36 = vmul.f32 %v2005_v33, %v1766_v34 }
 0xcee   : > { %v2282_v37 = vpop.eup %2281 }
 0xcef   : > { %v1784_v38 = vadd.f32 %v2006_v35, %v1776_v36  ;;  %v1767_v39 = vmul.f32 %v2282_v37, %v1753_v25 }
 0xcf1   : > { %v1777_v40 = vmul.f32 %v2005_v33, %v1767_v39  ;;  %1786 = vst [vmem:[%s485_s24] sm:$0xff] %v1784_v38 }
 0xcf3   : > { %v1785_v41 = vadd.f32 %v2006_v35, %v1777_v40 }
 0xcf5   : > { %1787 = vst [vmem:[%s485_s24 + $0x8] sm:$0xff] %v1785_v41 }
 0xcf6   : > { %2484 = shalt.err (!%p2481_p6)
}
 0xcf7   : > { %s2485_s17 = scalar_lea.hbm %s3031_s5, 256  ;;  %s2489_s16 = scalar_lea.hbm %s3085_s9, 512 }
 0xcf8   : > { %p2486_p13 = scmp.ne.s32.totalorder %s3031_s5, %s2485_s17  ;;  %p2490_p2 = scmp.lt.s32.totalorder %s3031_s5, %s3085_s9 }
 0xcf9   : > { %p2491_p0 = scmp.lt.s32.totalorder %s2489_s16, %s2485_s17 }
 0xcfa   : > { %p2487_p7 = pnand %p2486_p13, %p3134_p8 }
 0xcfb   : > { %p2492_p1 = por %p2491_p0, %p2490_p2 }
 0xcfc   : > { %p2488_p9 = pneg %p2487_p7 }
 0xcfe   : > { %p2493_p4 = pnand %p2492_p1, %p2488_p9 }
 0xd00   : > { %2496 = shalt.err (!%p2493_p4)
}
 0xd01   : > { %s2563_s25 = smov 128   ;;  %s2564_s19 = smov 8  }
 0xd02   : > { %2164 = dma.vmem_to_hbm [thread:$0]  (%p3134_p8), %s3033_s27, 256, %s3031_s5, %s1789_s21, %s2563_s25, %s2563_s25, %s2564_s19  }
 0xd03 PF: > { %s3135_s30 = sld [smem:[#allocation21_spill]] }
 0xd04   : > { %s3136_s14 = sld [smem:[#allocation23_spill]] }
 0xd05   : > { %s3137_s24 = sld [smem:[#allocation22_spill]] }
 0xd09   : > { %s1817_s22 = sand.u32 1, %s3135_s30  }
 0xd0a   : > { %p3138_p11 = scmp.ne.s32.totalorder %s3136_s14, 0  ;;  %s1818_s28 = scalar_lea.sflag [#allocation5], %s1817_s22 }
 0xd0b   : > { %p3139_p12 = scmp.ge.s32.totalorder %s3137_s24, 2 }
 0xd0d   : > { %p2190_p10 = pnand %p3139_p12, %p3138_p11 }
 0xd0f   : > { %p2191_p5 = pneg %p2190_p10 }
 0xd11   : > { %2530 = dma.done.wait (%p2191_p5), %s1818_s28, 256  }
 0xd12   : > { %2532 = vsyncadd (%p2191_p5), %s1818_s28, 4294967040  ;;  %s3140_s12 = sld [smem:[#allocation24_spill]]  ;;  %s3142_s30 = smov %s2539_s10 }
 0xd13   : > { %s3141_s20 = sld [smem:[#allocation25_spill]]  ;;  %s3143_s10 = smov %s2543_s11 }
 0xd18   : > { %p27_p3 = scmp.ge.s32.totalorder %s3140_s12, 4  }
 0xd19   : > { %s3144_s11 = smov %s3141_s20 }
 0xd1a   :  { %29 = sbr.rel (!%p27_p3) target bundleno = 13 (0xd), region = 141 }
 0xd1f   :  { %1823 = vsyncpa [#allocation4], 1 }
 0xd20   :  { %1825 = vsyncpa [#allocation4 + $0x1], 1 }
 0xd21   :  { %1826 = vsyncpa [#allocation7], 1 }
 0xd22   :  { %1828 = vsyncpa [#allocation7 + $0x1], 1 }
 0xd23   :  { %1829 = vsyncpa [#allocation10], 1 }
 0xd24   :  { %1830 = vsyncpa [#allocation13], 1 }
 0xd25   :  { %1831 = vsyncpa [#allocation5], 1 }
 0xd26   :  { %1833 = vsyncpa [#allocation5 + $0x1], 1 }

</bundles_post_ra>
